<compile_context>
chip_gen: v7x
topology: tpu7x:2x2x1
jax: 0.10.0
libtpu: 0.0.40
codegen_flags: <defaults>
</compile_context>

<pallas_src>
import functools

import jax
import jax.numpy as jnp
from jax.experimental import pallas as pl
from jax.experimental.pallas import tpu as pltpu


# ---------------------------------------------------------------------------
# Hyper-parameters (the `params` dict the PyTorch module was built with).
# ---------------------------------------------------------------------------
PARAMS = dict(
    DICT_SIZE=32,      # vocab size
    EMBED_DIM=16,      # embedding dim == conv "length" axis
    TOKEN_SIZE=8,      # sequence length == conv in_channels
    N_FILTER=4,        # conv out_channels
    FILTER_SIZE=3,     # conv kernel size
    STRIDE=1,
    PADDING=1,
    POOL_SIZE=2,
    N_HIDDEN_NODE=32,
)


def _derived_dims(p):
    l_out = (p["EMBED_DIM"] - p["FILTER_SIZE"] + 2 * p["PADDING"]) // p["STRIDE"] + 1
    l_pool = l_out // p["POOL_SIZE"]
    flat = p["N_FILTER"] * l_pool
    return l_out, l_pool, flat


# ---------------------------------------------------------------------------
# Host-side precompute: fuse (embedding, padding, conv, conv-bias) into MT and
# (fc, out) into W_fusedT / b_fused.
# ---------------------------------------------------------------------------
def build_fused_params(weights, p):
    emb_tab, conv_w, conv_b, fc_w, fc_b, out_w, out_b = weights
    l_out, l_pool, flat = _derived_dims(p)
    DICT = p["DICT_SIZE"]
    T = p["TOKEN_SIZE"]
    K = p["FILTER_SIZE"]
    stride = p["STRIDE"]
    pad = p["PADDING"]
    P = p["POOL_SIZE"]

    # emb_pad[d, :] = zero-padded embedding row d (conv padding baked in).
    emb_pad = jnp.pad(emb_tab, ((0, 0), (pad, pad)))              # (DICT, E+2p)
    # windows[d, l, k] = emb_pad[d, l*stride + k]  for l in [0, l_out)
    windows = jnp.stack(
        [emb_pad[:, k: k + stride * l_out: stride] for k in range(K)],
        axis=-1)                                                  # (DICT, l_out, K)
    # conv_map[c, d, f, l] = sum_k conv_w[f, c, k] * windows[d, l, k]
    conv_map = jnp.einsum("fck,dlk->cdfl", conv_w, windows)       # (T, DICT, F, l_out)

    # Keep only the positions MaxPool1d (floor semantics) consumes and reorder
    # so rows = (pool-phase r, filter f, pooled position j):
    #   MT[r*flat + f*l_pool + j, c*DICT + d]  <->  conv output (f, l=j*P+r)
    conv_map = conv_map[..., : l_pool * P]
    conv_map = conv_map.reshape(T, DICT, -1, l_pool, P)           # (T,DICT,F,l_pool,P)
    MT = jnp.transpose(conv_map, (4, 2, 3, 0, 1)).reshape(P * flat, T * DICT)

    # Fold conv bias into the channel-0 column block: every example hits
    # exactly one column in [0, DICT), so the bias is added exactly once.
    bias_rows = jnp.tile(jnp.repeat(conv_b, l_pool), P)           # (P*flat,)
    MT = MT.at[:, :DICT].add(bias_rows[:, None])

    # Fuse the two Linear layers (no nonlinearity between them in forward()):
    #   y.T = (out_w @ fc_w) @ flat.T + (out_w @ fc_b + out_b)[:, None]
    WfT = out_w @ fc_w                                            # (2, flat)
    bf = (out_w @ fc_b + out_b).reshape(2, 1)                     # (2, 1)

    return (MT.astype(jnp.float32), WfT.astype(jnp.float32), bf.astype(jnp.float32))


# ---------------------------------------------------------------------------
# Pallas kernel: one batch tile per grid step, two MXU dots total.
# ---------------------------------------------------------------------------
def _cnn_kernel(tok_ref, m_ref, w_ref, b_ref, o_ref, *,
                token_size, dict_size, flat, pool_size):
    tok = tok_ref[...]                                    # (T, Bt) int32
    bt = tok.shape[1]
    td = token_size * dict_size

    # Transposed one-hot: oh[c*DICT + d, b] = 1 iff tok[b, c] == d.
    iota = jax.lax.broadcasted_iota(jnp.int32, (td, bt), 0)
    oh = jnp.zeros((td, bt), jnp.float32)
    for c in range(token_size):                           # T cheap VPU compares
        oh = oh + (iota == (tok[c:c + 1, :] + c * dict_size)).astype(jnp.float32)

    # Fused embedding + padding + conv1d (+bias): (pool_size*flat, Bt).
    conv = jnp.dot(m_ref[...], oh, preferred_element_type=jnp.float32)

    # MaxPool1d as slab-max over aligned sublane slices; ReLU after (commutes).
    pooled = conv[0:flat, :]
    for r in range(1, pool_size):
        pooled = jnp.maximum(pooled, conv[r * flat:(r + 1) * flat, :])
    pooled = jnp.maximum(pooled, 0.0)

    # Fused fc + out Linear layers; output is (2, Bt) -> lane-dense in batch.
    o_ref[...] = (jnp.dot(w_ref[...], pooled,
                          preferred_element_type=jnp.float32) + b_ref[...])


# ---------------------------------------------------------------------------
# Wrapper: batch tiling + pallas_call.
# ---------------------------------------------------------------------------
def cnn_forward(tokens, weights, p, b_tile=512):
    _, _, flat = _derived_dims(p)
    T = p["TOKEN_SIZE"]
    DICT = p["DICT_SIZE"]
    P = p["POOL_SIZE"]

    MT, WfT, bf = build_fused_params(weights, p)

    B = tokens.shape[0]
    tokT = tokens.astype(jnp.int32).T                     # (T, B): batch on lanes

    if B <= b_tile:
        bt, n_blocks, Bp = B, 1, B                        # single full-extent block
    else:
        bt = b_tile                                       # multiple of 128
        n_blocks = pl.cdiv(B, bt)
        Bp = n_blocks * bt
        if Bp != B:
            tokT = jnp.pad(tokT, ((0, 0), (0, Bp - B)))   # pad with token 0

    kernel = functools.partial(_cnn_kernel, token_size=T, dict_size=DICT,
                               flat=flat, pool_size=P)

    yT = pl.pallas_call(
        kernel,
        out_shape=jax.ShapeDtypeStruct((2, Bp), jnp.float32),
        grid=(n_blocks,),
        in_specs=[
            pl.BlockSpec((T, bt), lambda i: (0, i)),              # tokens (tiled)
            pl.BlockSpec((P * flat, T * DICT), lambda i: (0, 0)),  # MT (resident)
            pl.BlockSpec((2, flat), lambda i: (0, 0)),             # W_fusedT
            pl.BlockSpec((2, 1), lambda i: (0, 0)),                # b_fused
        ],
        out_specs=pl.BlockSpec((2, bt), lambda i: (0, i)),
        compiler_params=pltpu.CompilerParams(
            dimension_semantics=("parallel",)),            # uses both TCs on v7x
    )(tokT, MT, WfT, bf)

    return yT[:, :B].T                                     # (B, 2)


# ---------------------------------------------------------------------------
# Pure-JAX reference (mirrors the PyTorch forward exactly).
# ---------------------------------------------------------------------------
def cnn_reference(tokens, weights, p):
    (emb_tab, conv_w, conv_b, fc_w, fc_b, out_w, out_b) = weights
    x = jnp.take(emb_tab, tokens, axis=0)                 # (B, T, E) == NCL
    x = jax.lax.conv_general_dilated(
        x, conv_w,
        window_strides=(p["STRIDE"],),
        padding=[(p["PADDING"], p["PADDING"])],
        dimension_numbers=("NCH", "OIH", "NCH"))
    x = x + conv_b[None, :, None]
    x = jnp.maximum(x, 0.0)
    B, F, L = x.shape
    l_pool = L // p["POOL_SIZE"]
    x = jnp.max(x[:, :, : l_pool * p["POOL_SIZE"]]
                .reshape(B, F, l_pool, p["POOL_SIZE"]), axis=-1)
    x = x.reshape(B, -1)
    x = x @ fc_w.T + fc_b
    y = x @ out_w.T + out_b
    return y


def init_weights(key, p):
    _, _, flat = _derived_dims(p)
    ks = jax.random.split(key, 7)
    emb_tab = jax.random.normal(ks[0], (p["DICT_SIZE"], p["EMBED_DIM"]),
                                jnp.float32) * 0.1
    conv_w = jax.random.normal(
        ks[1], (p["N_FILTER"], p["TOKEN_SIZE"], p["FILTER_SIZE"]),
        jnp.float32) * 0.1
    conv_b = jax.random.normal(ks[2], (p["N_FILTER"],), jnp.float32) * 0.1
    fc_w = jax.random.normal(ks[3], (p["N_HIDDEN_NODE"], flat),
                             jnp.float32) * 0.1
    fc_b = jax.random.normal(ks[4], (p["N_HIDDEN_NODE"],), jnp.float32) * 0.1
    out_w = jax.random.normal(ks[5], (2, p["N_HIDDEN_NODE"]),
                              jnp.float32) * 0.1
    out_b = jax.random.normal(ks[6], (2,), jnp.float32) * 0.1
    return (emb_tab, conv_w, conv_b, fc_w, fc_b, out_w, out_b)


if __name__ == "__main__":
    p = PARAMS
    key = jax.random.PRNGKey(0)
    k_tok, k_w, k_tok_big = jax.random.split(key, 3)
    weights = init_weights(k_w, p)

    # Small shapes consistent with the module: batch=2, seq=TOKEN_SIZE=8.
    tokens = jax.random.randint(k_tok, (2, p["TOKEN_SIZE"]), 0,
                                p["DICT_SIZE"], dtype=jnp.int32)
    y_kernel = jax.block_until_ready(cnn_forward(tokens, weights, p))
    y_ref = cnn_reference(tokens, weights, p)
    assert y_kernel.shape == (2, 2)
    assert jnp.allclose(y_kernel, y_ref, rtol=1e-4, atol=1e-4), (
        f"mismatch:\n{y_kernel}\nvs\n{y_ref}")

    # Larger batch exercises the batch grid (2 tiles of 512) + padding path.
    tokens_big = jax.random.randint(k_tok_big, (1000, p["TOKEN_SIZE"]), 0,
                                    p["DICT_SIZE"], dtype=jnp.int32)
    y_big = jax.block_until_ready(cnn_forward(tokens_big, weights, p))
    y_big_ref = cnn_reference(tokens_big, weights, p)
    assert y_big.shape == (1000, 2)
    assert jnp.allclose(y_big, y_big_ref, rtol=1e-4, atol=1e-4)

    print("KERNEL_OK")
</pallas_src>

<mosaic_0001>
module attributes {stable_mosaic.version = 11 : i64} {
  func.func @_cnn_kernel(%arg0: i32, %arg1: memref<8x2xi32, #tpu.memory_space<vmem>>, %arg2: memref<64x256xf32, #tpu.memory_space<vmem>>, %arg3: memref<2x32xf32, #tpu.memory_space<vmem>>, %arg4: memref<2x1xf32, #tpu.memory_space<vmem>>, %arg5: memref<2x2xf32, #tpu.memory_space<vmem>>) attributes {dimension_semantics = [#tpu.dimension_semantics<parallel>], iteration_bounds = array<i64: 1>, scalar_prefetch = 0 : i64, scratch_operands = 0 : i64, tpu.core_type = #tpu.core_type<tc>, window_params = [{transform_indices = @transform_0, window_bounds = array<i64: 8, 2>}, {pipeline_mode = #tpu.pipeline_mode<synchronous>, transform_indices = @transform_1, window_bounds = array<i64: 64, 256>}, {pipeline_mode = #tpu.pipeline_mode<synchronous>, transform_indices = @transform_2, window_bounds = array<i64: 2, 32>}, {pipeline_mode = #tpu.pipeline_mode<synchronous>, transform_indices = @transform_3, window_bounds = array<i64: 2, 1>}, {transform_indices = @transform_4, window_bounds = array<i64: 2, 2>}]} {
    %c0 = arith.constant 0 : index
    %c0_0 = arith.constant 0 : index
    %0 = vector.load %arg1[%c0, %c0_0] : memref<8x2xi32, #tpu.memory_space<vmem>>, vector<8x2xi32>
    %1 = tpu.iota {dimensions = array<i32: 0>} : vector<256x2xi32>
    %cst = arith.constant 0.000000e+00 : f32
    %2 = vector.broadcast %cst : f32 to vector<256x2xf32>
    %3 = vector.extract_strided_slice %0 {offsets = [0, 0], sizes = [1, 2], strides = [1, 1]} : vector<8x2xi32> to vector<1x2xi32>
    %c0_i32 = arith.constant 0 : i32
    %4 = vector.broadcast %c0_i32 : i32 to vector<1x2xi32>
    %5 = arith.addi %3, %4 : vector<1x2xi32>
    %6 = vector.broadcast %5 : vector<1x2xi32> to vector<256x2xi32>
    %7 = arith.cmpi eq, %1, %6 : vector<256x2xi32>
    %8 = arith.extui %7 : vector<256x2xi1> to vector<256x2xi32>
    %9 = arith.sitofp %8 : vector<256x2xi32> to vector<256x2xf32>
    %10 = arith.addf %2, %9 : vector<256x2xf32>
    %11 = vector.extract_strided_slice %0 {offsets = [1, 0], sizes = [1, 2], strides = [1, 1]} : vector<8x2xi32> to vector<1x2xi32>
    %c32_i32 = arith.constant 32 : i32
    %12 = vector.broadcast %c32_i32 : i32 to vector<1x2xi32>
    %13 = arith.addi %11, %12 : vector<1x2xi32>
    %14 = vector.broadcast %13 : vector<1x2xi32> to vector<256x2xi32>
    %15 = arith.cmpi eq, %1, %14 : vector<256x2xi32>
    %16 = arith.extui %15 : vector<256x2xi1> to vector<256x2xi32>
    %17 = arith.sitofp %16 : vector<256x2xi32> to vector<256x2xf32>
    %18 = arith.addf %10, %17 : vector<256x2xf32>
    %19 = vector.extract_strided_slice %0 {offsets = [2, 0], sizes = [1, 2], strides = [1, 1]} : vector<8x2xi32> to vector<1x2xi32>
    %c64_i32 = arith.constant 64 : i32
    %20 = vector.broadcast %c64_i32 : i32 to vector<1x2xi32>
    %21 = arith.addi %19, %20 : vector<1x2xi32>
    %22 = vector.broadcast %21 : vector<1x2xi32> to vector<256x2xi32>
    %23 = arith.cmpi eq, %1, %22 : vector<256x2xi32>
    %24 = arith.extui %23 : vector<256x2xi1> to vector<256x2xi32>
    %25 = arith.sitofp %24 : vector<256x2xi32> to vector<256x2xf32>
    %26 = arith.addf %18, %25 : vector<256x2xf32>
    %27 = vector.extract_strided_slice %0 {offsets = [3, 0], sizes = [1, 2], strides = [1, 1]} : vector<8x2xi32> to vector<1x2xi32>
    %c96_i32 = arith.constant 96 : i32
    %28 = vector.broadcast %c96_i32 : i32 to vector<1x2xi32>
    %29 = arith.addi %27, %28 : vector<1x2xi32>
    %30 = vector.broadcast %29 : vector<1x2xi32> to vector<256x2xi32>
    %31 = arith.cmpi eq, %1, %30 : vector<256x2xi32>
    %32 = arith.extui %31 : vector<256x2xi1> to vector<256x2xi32>
    %33 = arith.sitofp %32 : vector<256x2xi32> to vector<256x2xf32>
    %34 = arith.addf %26, %33 : vector<256x2xf32>
    %35 = vector.extract_strided_slice %0 {offsets = [4, 0], sizes = [1, 2], strides = [1, 1]} : vector<8x2xi32> to vector<1x2xi32>
    %c128_i32 = arith.constant 128 : i32
    %36 = vector.broadcast %c128_i32 : i32 to vector<1x2xi32>
    %37 = arith.addi %35, %36 : vector<1x2xi32>
    %38 = vector.broadcast %37 : vector<1x2xi32> to vector<256x2xi32>
    %39 = arith.cmpi eq, %1, %38 : vector<256x2xi32>
    %40 = arith.extui %39 : vector<256x2xi1> to vector<256x2xi32>
    %41 = arith.sitofp %40 : vector<256x2xi32> to vector<256x2xf32>
    %42 = arith.addf %34, %41 : vector<256x2xf32>
    %43 = vector.extract_strided_slice %0 {offsets = [5, 0], sizes = [1, 2], strides = [1, 1]} : vector<8x2xi32> to vector<1x2xi32>
    %c160_i32 = arith.constant 160 : i32
    %44 = vector.broadcast %c160_i32 : i32 to vector<1x2xi32>
    %45 = arith.addi %43, %44 : vector<1x2xi32>
    %46 = vector.broadcast %45 : vector<1x2xi32> to vector<256x2xi32>
    %47 = arith.cmpi eq, %1, %46 : vector<256x2xi32>
    %48 = arith.extui %47 : vector<256x2xi1> to vector<256x2xi32>
    %49 = arith.sitofp %48 : vector<256x2xi32> to vector<256x2xf32>
    %50 = arith.addf %42, %49 : vector<256x2xf32>
    %51 = vector.extract_strided_slice %0 {offsets = [6, 0], sizes = [1, 2], strides = [1, 1]} : vector<8x2xi32> to vector<1x2xi32>
    %c192_i32 = arith.constant 192 : i32
    %52 = vector.broadcast %c192_i32 : i32 to vector<1x2xi32>
    %53 = arith.addi %51, %52 : vector<1x2xi32>
    %54 = vector.broadcast %53 : vector<1x2xi32> to vector<256x2xi32>
    %55 = arith.cmpi eq, %1, %54 : vector<256x2xi32>
    %56 = arith.extui %55 : vector<256x2xi1> to vector<256x2xi32>
    %57 = arith.sitofp %56 : vector<256x2xi32> to vector<256x2xf32>
    %58 = arith.addf %50, %57 : vector<256x2xf32>
    %59 = vector.extract_strided_slice %0 {offsets = [7, 0], sizes = [1, 2], strides = [1, 1]} : vector<8x2xi32> to vector<1x2xi32>
    %c224_i32 = arith.constant 224 : i32
    %60 = vector.broadcast %c224_i32 : i32 to vector<1x2xi32>
    %61 = arith.addi %59, %60 : vector<1x2xi32>
    %62 = vector.broadcast %61 : vector<1x2xi32> to vector<256x2xi32>
    %63 = arith.cmpi eq, %1, %62 : vector<256x2xi32>
    %64 = arith.extui %63 : vector<256x2xi1> to vector<256x2xi32>
    %65 = arith.sitofp %64 : vector<256x2xi32> to vector<256x2xf32>
    %66 = arith.addf %58, %65 : vector<256x2xf32>
    %c0_1 = arith.constant 0 : index
    %c0_2 = arith.constant 0 : index
    %67 = vector.load %arg2[%c0_1, %c0_2] : memref<64x256xf32, #tpu.memory_space<vmem>>, vector<64x256xf32>
    %cst_3 = arith.constant dense<0.000000e+00> : vector<64x2xf32>
    %68 = tpu.matmul %67, %66, %cst_3 {dimension_numbers = #tpu.dot_dimension_numbers<[1], [0], [0], [1], [0, 0, 1, 1], [], []>} : vector<64x256xf32>, vector<256x2xf32>, vector<64x2xf32> -> vector<64x2xf32>
    %69 = vector.extract_strided_slice %68 {offsets = [0, 0], sizes = [32, 2], strides = [1, 1]} : vector<64x2xf32> to vector<32x2xf32>
    %70 = vector.extract_strided_slice %68 {offsets = [32, 0], sizes = [32, 2], strides = [1, 1]} : vector<64x2xf32> to vector<32x2xf32>
    %71 = arith.maximumf %69, %70 : vector<32x2xf32>
    %cst_4 = arith.constant 0.000000e+00 : f32
    %72 = vector.broadcast %cst_4 : f32 to vector<32x2xf32>
    %73 = arith.maximumf %71, %72 : vector<32x2xf32>
    %c0_5 = arith.constant 0 : index
    %c0_6 = arith.constant 0 : index
    %74 = vector.load %arg3[%c0_5, %c0_6] : memref<2x32xf32, #tpu.memory_space<vmem>>, vector<2x32xf32>
    %cst_7 = arith.constant dense<0.000000e+00> : vector<2x2xf32>
    %75 = tpu.matmul %74, %73, %cst_7 {dimension_numbers = #tpu.dot_dimension_numbers<[1], [0], [0], [1], [0, 0, 1, 1], [], []>} : vector<2x32xf32>, vector<32x2xf32>, vector<2x2xf32> -> vector<2x2xf32>
    %c0_8 = arith.constant 0 : index
    %c0_9 = arith.constant 0 : index
    %76 = vector.load %arg4[%c0_8, %c0_9] : memref<2x1xf32, #tpu.memory_space<vmem>>, vector<2x1xf32>
    %77 = vector.broadcast %76 : vector<2x1xf32> to vector<2x2xf32>
    %78 = arith.addf %75, %77 : vector<2x2xf32>
    %c0_10 = arith.constant 0 : index
    %c0_11 = arith.constant 0 : index
    %79 = vector.load %arg5[%c0_10, %c0_11] : memref<2x2xf32, #tpu.memory_space<vmem>>, vector<2x2xf32>
    tpu.vector_store %arg5[%c0_10, %c0_11], %78 {strides = array<i32>} : memref<2x2xf32, #tpu.memory_space<vmem>>, vector<2x2xf32>,
    return
  }
  func.func @transform_0(%arg0: i32) -> (i32, i32) {
    %c0_i32 = arith.constant 0 : i32
    %c0_i32_0 = arith.constant 0 : i32
    return %c0_i32, %arg0 : i32, i32
  }
  func.func @transform_1(%arg0: i32) -> (i32, i32) {
    %c0_i32 = arith.constant 0 : i32
    %c0_i32_0 = arith.constant 0 : i32
    %c0_i32_1 = arith.constant 0 : i32
    return %c0_i32, %c0_i32_0 : i32, i32
  }
  func.func @transform_2(%arg0: i32) -> (i32, i32) {
    %c0_i32 = arith.constant 0 : i32
    %c0_i32_0 = arith.constant 0 : i32
    %c0_i32_1 = arith.constant 0 : i32
    return %c0_i32, %c0_i32_0 : i32, i32
  }
  func.func @transform_3(%arg0: i32) -> (i32, i32) {
    %c0_i32 = arith.constant 0 : i32
    %c0_i32_0 = arith.constant 0 : i32
    %c0_i32_1 = arith.constant 0 : i32
    return %c0_i32, %c0_i32_0 : i32, i32
  }
  func.func @transform_4(%arg0: i32) -> (i32, i32) {
    %c0_i32 = arith.constant 0 : i32
    %c0_i32_0 = arith.constant 0 : i32
    return %c0_i32, %arg0 : i32, i32
  }
}

</mosaic_0001>

<bundles_post_ra>
// kernel: tpu_custom_call.1
= control target key start
LH: loop header
LB: loop body
LE: loop exit
PB: predicated region body
PF: predicated region fallthrough
CT: control target
= control target key end

     0   :  { %9 = vsyncpa [#allocation3], 0  ;;  %s2613_s0 = inlined_call_operand.vmem [shape: s32[8,2], index: 0, kind: input, shape index: {}]   ;;  %s2614_s1 = inlined_call_operand.hbm [shape: f32[64,256], index: 1, kind: input, shape index: {}]   ;;  %s2615_s2 = inlined_call_operand.vmem [shape: f32[2,32], index: 2, kind: input, shape index: {}]   ;;  %s2616_s3 = inlined_call_operand.vmem [shape: f32[2,1], index: 3, kind: input, shape index: {}]   ;;  %s2617_s4 = inlined_call_operand.hbm [shape: f32[2,2], index: 4, kind: output, shape index: {}]  }
   0x1   :  { %10 = vsyncpa [#allocation4], 0  ;;  %s1796_s15 = smov [#allocation2]   ;;  %s1748_s19 = scalar_lea.hbm %s2614_s1, 2048 }
   0x2   :  { %s18_s16 = sshll.u32 %s1796_s15, 4  ;;  %p1749_p0 = scmp.ne.s32.totalorder %s2614_s1, %s1748_s19  ;;  %s19_s16 = int_to_ptr.vmem [resolvable:$true] %s18_s16 }
   0x3   :  { %p1752_p1 = scmp.lt.u32.totalorder %s1748_s19, %s2614_s1 }
   0x5   :  { %p1754_p2 = pnand %p1752_p1, %p1749_p0 }
   0x7   :  { %1757 = shalt.err (!%p1754_p2)
}
   0x8   :  { %s1758_s24 = scalar_lea.vmem %s19_s16, 2048  ;;  %p1763_p4 = scmp.lt.s32.totalorder %s19_s16, %s19_s16 }
   0x9   :  { %p1759_p3 = scmp.ne.s32.totalorder %s19_s16, %s1758_s24  ;;  %p1764_p5 = scmp.lt.s32.totalorder %s1758_s24, %s1758_s24 }
   0xb   :  { %p1765_p6 = por %p1764_p5, %p1763_p4 }
   0xd   :  { %p1766_p7 = pnand %p1765_p6, %p1759_p3 }
   0xf   :  { %1769 = shalt.err (!%p1766_p7)
}
  0x10   :  { %s1797_s25 = smov 256   ;;  %s1798_s26 = smov 16  }
  0x11   :  { %24 = dma.hbm_to_vmem [thread:$0]  %s2614_s1, 2048, %s19_s16, [#allocation3], %s1797_s25, %s1797_s25, %s1798_s26  }
  0x12   :  { %1792 = dma.done.wait [#allocation3], 2048  }
  0x13   :  { %1793 = vsyncadd [#allocation3], 4294965248  ;;  %v33_v0 = vlaneseq  ;;  %v32_v14 = vld [vmem:[%s2613_s0] sm:$0xff]  ;;  %v1799_v29 = vmov 0.0   ;;  %s1803_s6 = smov [#allocation5]  }
  0x14   :  { %v198_v20 = vadd.s32 32, %v32_v14  ;;  %v331_v21 = vadd.s32 64, %v32_v14  ;;  %v464_v22 = vadd.s32 96, %v32_v14  ;;  %v597_v23 = vadd.s32 128, %v32_v14  ;;  %s1347_s7 = sshll.u32 %s1803_s6, 4  ;;  %s1348_s7 = int_to_ptr.vmem [resolvable:$true] %s1347_s7 }
  0x15   :  { %v1841_v1 = vshrl.u32 %v33_v0, 7  ;;  %v730_v24 = vadd.s32 160, %v32_v14  ;;  %v863_v25 = vadd.s32 192, %v32_v14  ;;  %v996_v26 = vadd.s32 224, %v32_v14  ;;  %s1770_s8 = scalar_lea.vmem %s1348_s7, 32  ;;  %p1775_p9 = scmp.lt.s32.totalorder %s1348_s7, %s1348_s7 }
  0x16   :  { %p1771_p8 = scmp.ne.s32.totalorder %s1348_s7, %s1770_s8  ;;  %p1776_p10 = scmp.lt.s32.totalorder %s1770_s8, %s1770_s8 }
  0x17   :  { %v1844_v2 = vadd.s32 128, %v1841_v1  ;;  %v1847_v3 = vadd.s32 136, %v1841_v1  ;;  %v68_v4 = vsub.s32 0, %v1841_v1  ;;  %v201_v5 = vsub.s32 1, %v1841_v1 }
  0x18   :  { %v334_v6 = vsub.s32 2, %v1841_v1  ;;  %v467_v7 = vsub.s32 3, %v1841_v1  ;;  %v600_v8 = vsub.s32 4, %v1841_v1  ;;  %v733_v9 = vsub.s32 5, %v1841_v1  ;;  %p1777_p11 = por %p1776_p10, %p1775_p9 }
  0x19   :  { %v866_v10 = vsub.s32 6, %v1841_v1  ;;  %v999_v11 = vsub.s32 7, %v1841_v1  ;;  %v1858_v12 = vadd.s32 8, %v1841_v1  ;;  %v1861_v13 = vadd.s32 144, %v1841_v1 }
  0x1a   :  { %v1867_v15 = vadd.s32 152, %v1841_v1  ;;  %v1870_v16 = vadd.s32 16, %v1841_v1  ;;  %v1873_v17 = vadd.s32 24, %v1841_v1  ;;  %v1876_v18 = vadd.s32 160, %v1841_v1  ;;  %p1778_p12 = pnand %p1777_p11, %p1771_p8 }
  0x1b   :  { %v1878_v19 = vrot.slane %v32_v14, %v68_v4  ;;  %v1884_v27 = vrot.slane %v198_v20, %v201_v5  ;;  %v1886_v28 = vrot.slane %v331_v21, %v334_v6  ;;  %v1890_v32 = vrot.slane %v464_v22, %v467_v7 }
  0x1c   :  { %v1892_v33 = vrot.slane %v597_v23, %v600_v8  ;;  %v1918_v46 = vrot.slane %v730_v24, %v733_v9  ;;  %v1920_v47 = vrot.slane %v863_v25, %v866_v10  ;;  %v1922_v48 = vrot.slane %v996_v26, %v999_v11 }
  0x1d   :  { %vm86_vm0 = vcmp.eq.s32.totalorder %v1844_v2, %v1878_v19  ;;  %vm87_vm1 = vcmp.eq.s32.totalorder %v1847_v3, %v1878_v19  ;;  %vm219_vm2 = vcmp.eq.s32.totalorder %v1844_v2, %v1884_v27  ;;  %vm220_vm3 = vcmp.eq.s32.totalorder %v1847_v3, %v1884_v27 }
  0x1e   :  { %v1372_v30 = vsel %vm86_vm0, 1.0, %v1799_v29  ;;  %v1373_v31 = vsel %vm87_vm1, 1.0, %v1799_v29  ;;  %vm352_vm4 = vcmp.eq.s32.totalorder %v1844_v2, %v1886_v28  ;;  %vm353_vm5 = vcmp.eq.s32.totalorder %v1847_v3, %v1886_v28 }
  0x1f   :  { %v1404_v34 = vsel %vm219_vm2, 1.0, %v1799_v29  ;;  %v1405_v35 = vsel %vm220_vm3, 1.0, %v1799_v29  ;;  %v1436_v36 = vsel %vm352_vm4, 1.0, %v1799_v29  ;;  %v1437_v37 = vsel %vm353_vm5, 1.0, %v1799_v29 }
  0x20   :  { %v315_v38 = vadd.f32 %v1404_v34, %v1372_v30  ;;  %v316_v39 = vadd.f32 %v1405_v35, %v1373_v31  ;;  %vm485_vm6 = vcmp.eq.s32.totalorder %v1844_v2, %v1890_v32  ;;  %vm486_vm7 = vcmp.eq.s32.totalorder %v1847_v3, %v1890_v32 }
  0x21   :  { %v1468_v40 = vsel %vm485_vm6, 1.0, %v1799_v29  ;;  %v1469_v41 = vsel %vm486_vm7, 1.0, %v1799_v29  ;;  %vm618_vm8 = vcmp.eq.s32.totalorder %v1844_v2, %v1892_v33  ;;  %vm619_vm9 = vcmp.eq.s32.totalorder %v1847_v3, %v1892_v33 }
  0x22   :  { %v448_v42 = vadd.f32 %v1436_v36, %v315_v38  ;;  %v449_v43 = vadd.f32 %v1437_v37, %v316_v39  ;;  %v1500_v44 = vsel %vm618_vm8, 1.0, %v1799_v29  ;;  %v1501_v45 = vsel %vm619_vm9, 1.0, %v1799_v29 }
  0x23   :  { %vm70_vm10 = vcmp.eq.s32.totalorder %v1841_v1, %v1878_v19  ;;  %vm71_vm11 = vcmp.eq.s32.totalorder %v1858_v12, %v1878_v19  ;;  %vm751_vm12 = vcmp.eq.s32.totalorder %v1844_v2, %v1918_v46  ;;  %vm752_vm13 = vcmp.eq.s32.totalorder %v1847_v3, %v1918_v46 }
  0x24   :  { %v581_v49 = vadd.f32 %v1468_v40, %v448_v42  ;;  %v582_v50 = vadd.f32 %v1469_v41, %v449_v43  ;;  %v1356_v51 = vsel %vm70_vm10, 1.0, %v1799_v29  ;;  %vm884_vm14 = vcmp.eq.s32.totalorder %v1844_v2, %v1920_v47 }
  0x25   :  { %vm885_vm15 = vcmp.eq.s32.totalorder %v1847_v3, %v1920_v47  ;;  %v1532_v54 = vsel %vm751_vm12, 1.0, %v1799_v29  ;;  %v1533_v55 = vsel %vm752_vm13, 1.0, %v1799_v29  ;;  %v1564_v56 = vsel %vm884_vm14, 1.0, %v1799_v29 }
  0x26   :  { %v714_v52 = vadd.f32 %v1500_v44, %v581_v49  ;;  %v715_v53 = vadd.f32 %v1501_v45, %v582_v50  ;;  %v1565_v57 = vsel %vm885_vm15, 1.0, %v1799_v29  ;;  %vm1017_vm0 = vcmp.eq.s32.totalorder %v1844_v2, %v1922_v48 }
  0x27   :  { %vm1018_vm1 = vcmp.eq.s32.totalorder %v1847_v3, %v1922_v48  ;;  %v1596_v60 = vsel %vm1017_vm0, 1.0, %v1799_v29  ;;  %v1357_v62 = vsel %vm71_vm11, 1.0, %v1799_v29  ;;  %vm203_vm2 = vcmp.eq.s32.totalorder %v1841_v1, %v1884_v27 }
  0x28   :  { %v847_v58 = vadd.f32 %v1532_v54, %v714_v52  ;;  %v848_v59 = vadd.f32 %v1533_v55, %v715_v53  ;;  %v1597_v61 = vsel %vm1018_vm1, 1.0, %v1799_v29  ;;  %vm204_vm3 = vcmp.eq.s32.totalorder %v1858_v12, %v1884_v27 }
  0x29   :  { %vm336_vm4 = vcmp.eq.s32.totalorder %v1841_v1, %v1886_v28  ;;  %v1388_v2 = vsel %vm203_vm2, 1.0, %v1799_v29  ;;  %v1389_v3 = vsel %vm204_vm3, 1.0, %v1799_v29  ;;  %vm337_vm5 = vcmp.eq.s32.totalorder %v1858_v12, %v1886_v28 }
  0x2a   :  { %v980_v63 = vadd.f32 %v1564_v56, %v847_v58  ;;  %v981_v0 = vadd.f32 %v1565_v57, %v848_v59  ;;  %v299_v4 = vadd.f32 %v1388_v2, %v1356_v51  ;;  %v300_v5 = vadd.f32 %v1389_v3, %v1357_v62 }
  0x2b   :  { %v1420_v6 = vsel %vm336_vm4, 1.0, %v1799_v29  ;;  %v1421_v9 = vsel %vm337_vm5, 1.0, %v1799_v29  ;;  %vm469_vm6 = vcmp.eq.s32.totalorder %v1841_v1, %v1890_v32  ;;  %vm470_vm7 = vcmp.eq.s32.totalorder %v1858_v12, %v1890_v32 }
  0x2c   :  { %v1113_v7 = vadd.f32 %v1596_v60, %v980_v63  ;;  %v1114_v8 = vadd.f32 %v1597_v61, %v981_v0  ;;  %v432_v10 = vadd.f32 %v1420_v6, %v299_v4  ;;  %v433_v11 = vadd.f32 %v1421_v9, %v300_v5 }
  0x2d   :  { %v1452_v14 = vsel %vm469_vm6, 1.0, %v1799_v29  ;;  %v1453_v21 = vsel %vm470_vm7, 1.0, %v1799_v29  ;;  %vm602_vm8 = vcmp.eq.s32.totalorder %v1841_v1, %v1892_v33  ;;  %vm603_vm9 = vcmp.eq.s32.totalorder %v1858_v12, %v1892_v33 }
  0x2e   :  { %v1685_v20 = vpack.c.bf16 %v1114_v8, %v1113_v7  ;;  %v565_v22 = vadd.f32 %v1452_v14, %v432_v10  ;;  %v566_v23 = vadd.f32 %v1453_v21, %v433_v11  ;;  %v1484_v24 = vsel %vm602_vm8, 1.0, %v1799_v29 }
  0x2f   :  { %v1485_v25 = vsel %vm603_vm9, 1.0, %v1799_v29  ;;  %vm735_vm10 = vcmp.eq.s32.totalorder %v1841_v1, %v1918_v46  ;;  %vm736_vm11 = vcmp.eq.s32.totalorder %v1858_v12, %v1918_v46  ;;  %vm868_vm12 = vcmp.eq.s32.totalorder %v1841_v1, %v1920_v47 }
  0x30   :  { %1686 = vmatprep.subr.bf16.mxu0 %v1685_v20  ;;  %vm869_vm13 = vcmp.eq.s32.totalorder %v1858_v12, %v1920_v47  ;;  %v698_v26 = vadd.f32 %v1484_v24, %v565_v22  ;;  %v699_v30 = vadd.f32 %v1485_v25, %v566_v23  ;;  %v1516_v31 = vsel %vm735_vm10, 1.0, %v1799_v29  ;;  %1723 = vmatprep.subr.bf16.mxu1 %v1685_v20 }
  0x31   :  { %v1517_v34 = vsel %vm736_vm11, 1.0, %v1799_v29  ;;  %v1548_v35 = vsel %vm868_vm12, 1.0, %v1799_v29  ;;  %v1549_v36 = vsel %vm869_vm13, 1.0, %v1799_v29  ;;  %vm1001_vm14 = vcmp.eq.s32.totalorder %v1841_v1, %v1922_v48 }
  0x32   :  { %vm1002_vm15 = vcmp.eq.s32.totalorder %v1858_v12, %v1922_v48  ;;  %v831_v37 = vadd.f32 %v1516_v31, %v698_v26  ;;  %v832_v38 = vadd.f32 %v1517_v34, %v699_v30  ;;  %v1580_v39 = vsel %vm1001_vm14, 1.0, %v1799_v29 }
  0x33   :  { %v1581_v40 = vsel %vm1002_vm15, 1.0, %v1799_v29  ;;  %vm88_vm0 = vcmp.eq.s32.totalorder %v1861_v13, %v1878_v19  ;;  %vm89_vm1 = vcmp.eq.s32.totalorder %v1867_v15, %v1878_v19  ;;  %vm221_vm2 = vcmp.eq.s32.totalorder %v1861_v13, %v1884_v27 }
  0x34   :  { %vm222_vm3 = vcmp.eq.s32.totalorder %v1867_v15, %v1884_v27  ;;  %v964_v41 = vadd.f32 %v1548_v35, %v831_v37  ;;  %v965_v12 = vadd.f32 %v1549_v36, %v832_v38  ;;  %v1374_v42 = vsel %vm88_vm0, 1.0, %v1799_v29 }
  0x35   :  { %v1375_v43 = vsel %vm89_vm1, 1.0, %v1799_v29  ;;  %v1406_v44 = vsel %vm221_vm2, 1.0, %v1799_v29  ;;  %v1407_v45 = vsel %vm222_vm3, 1.0, %v1799_v29  ;;  %vm354_vm4 = vcmp.eq.s32.totalorder %v1861_v13, %v1886_v28 }
  0x36   :  { %vm355_vm5 = vcmp.eq.s32.totalorder %v1867_v15, %v1886_v28  ;;  %v1097_v49 = vadd.f32 %v1580_v39, %v964_v41  ;;  %v1098_v50 = vadd.f32 %v1581_v40, %v965_v12  ;;  %v317_v51 = vadd.f32 %v1406_v44, %v1374_v42 }
  0x37   :  { %v318_v52 = vadd.f32 %v1407_v45, %v1375_v43  ;;  %v1438_v53 = vsel %vm354_vm4, 1.0, %v1799_v29  ;;  %v1439_v54 = vsel %vm355_vm5, 1.0, %v1799_v29  ;;  %vm487_vm6 = vcmp.eq.s32.totalorder %v1861_v13, %v1890_v32 }
  0x38   :  { %vm488_vm7 = vcmp.eq.s32.totalorder %v1867_v15, %v1890_v32  ;;  %v1687_v55 = vpack.c.bf16 %v1098_v50, %v1097_v49  ;;  %v450_v56 = vadd.f32 %v1438_v53, %v317_v51  ;;  %v1470_v58 = vsel %vm487_vm6, 1.0, %v1799_v29 }
  0x39   :  { %v451_v57 = vadd.f32 %v1439_v54, %v318_v52  ;;  %v1471_v59 = vsel %vm488_vm7, 1.0, %v1799_v29  ;;  %vm620_vm8 = vcmp.eq.s32.totalorder %v1861_v13, %v1892_v33  ;;  %vm621_vm9 = vcmp.eq.s32.totalorder %v1867_v15, %v1892_v33 }
  0x3a   :  { %vm753_vm10 = vcmp.eq.s32.totalorder %v1861_v13, %v1918_v46  ;;  %1688 = vmatpush3.bf16.msra.mxu0 %v1687_v55  ;;  %v583_v60 = vadd.f32 %v1470_v58, %v450_v56  ;;  %v1502_v62 = vsel %vm620_vm8, 1.0, %v1799_v29  ;;  %v1503_v63 = vsel %vm621_vm9, 1.0, %v1799_v29  ;;  %1731 = vmatpush3.bf16.msra.mxu1 %v1687_v55 }
  0x3b   :  { %v584_v61 = vadd.f32 %v1471_v59, %v451_v57  ;;  %vm754_vm11 = vcmp.eq.s32.totalorder %v1867_v15, %v1918_v46  ;;  %v1534_v0 = vsel %vm753_vm10, 1.0, %v1799_v29  ;;  %vm886_vm12 = vcmp.eq.s32.totalorder %v1861_v13, %v1920_v47 }
  0x3c   :  { %vm887_vm13 = vcmp.eq.s32.totalorder %v1867_v15, %v1920_v47  ;;  %v716_v2 = vadd.f32 %v1502_v62, %v583_v60  ;;  %v1535_v4 = vsel %vm754_vm11, 1.0, %v1799_v29  ;;  %v1566_v5 = vsel %vm886_vm12, 1.0, %v1799_v29 }
  0x3d   :  { %v717_v3 = vadd.f32 %v1503_v63, %v584_v61  ;;  %v1567_v6 = vsel %vm887_vm13, 1.0, %v1799_v29  ;;  %vm1019_vm14 = vcmp.eq.s32.totalorder %v1861_v13, %v1922_v48  ;;  %vm1020_vm15 = vcmp.eq.s32.totalorder %v1867_v15, %v1922_v48 }
  0x3e   :  { %vm72_vm0 = vcmp.eq.s32.totalorder %v1870_v16, %v1878_v19  ;;  %v849_v7 = vadd.f32 %v1534_v0, %v716_v2  ;;  %v1598_v9 = vsel %vm1019_vm14, 1.0, %v1799_v29  ;;  %v1599_v10 = vsel %vm1020_vm15, 1.0, %v1799_v29 }
  0x3f   :  { %v850_v8 = vadd.f32 %v1535_v4, %v717_v3  ;;  %vm73_vm1 = vcmp.eq.s32.totalorder %v1873_v17, %v1878_v19  ;;  %v1358_v11 = vsel %vm72_vm0, 1.0, %v1799_v29  ;;  %vm205_vm2 = vcmp.eq.s32.totalorder %v1870_v16, %v1884_v27 }
  0x40   :  { %vm206_vm3 = vcmp.eq.s32.totalorder %v1873_v17, %v1884_v27  ;;  %v982_v13 = vadd.f32 %v1566_v5, %v849_v7  ;;  %v1359_v14 = vsel %vm73_vm1, 1.0, %v1799_v29  ;;  %v1390_v20 = vsel %vm205_vm2, 1.0, %v1799_v29 }
  0x41   :  { %v983_v15 = vadd.f32 %v1567_v6, %v850_v8  ;;  %v1391_v21 = vsel %vm206_vm3, 1.0, %v1799_v29  ;;  %v301_v22 = vadd.f32 %v1390_v20, %v1358_v11  ;;  %vm338_vm4 = vcmp.eq.s32.totalorder %v1870_v16, %v1886_v28 }
  0x42   :  { %vm339_vm5 = vcmp.eq.s32.totalorder %v1873_v17, %v1886_v28  ;;  %v1115_v23 = vadd.f32 %v1598_v9, %v982_v13  ;;  %v302_v25 = vadd.f32 %v1391_v21, %v1359_v14  ;;  %v1422_v26 = vsel %vm338_vm4, 1.0, %v1799_v29 }
  0x43   :  { %v1116_v24 = vadd.f32 %v1599_v10, %v983_v15  ;;  %v1423_v30 = vsel %vm339_vm5, 1.0, %v1799_v29  ;;  %v434_v31 = vadd.f32 %v1422_v26, %v301_v22  ;;  %vm471_vm6 = vcmp.eq.s32.totalorder %v1870_v16, %v1890_v32 }
  0x44   :  { %vm472_vm7 = vcmp.eq.s32.totalorder %v1873_v17, %v1890_v32  ;;  %v435_v35 = vadd.f32 %v1423_v30, %v302_v25  ;;  %v1454_v36 = vsel %vm471_vm6, 1.0, %v1799_v29  ;;  %vm604_vm8 = vcmp.eq.s32.totalorder %v1870_v16, %v1892_v33 }
  0x45   :  { %v1689_v34 = vpack.c.bf16 %v1116_v24, %v1115_v23  ;;  %v1455_v37 = vsel %vm472_vm7, 1.0, %v1799_v29  ;;  %v567_v38 = vadd.f32 %v1454_v36, %v434_v31  ;;  %vm605_vm9 = vcmp.eq.s32.totalorder %v1873_v17, %v1892_v33 }
  0x46   :  { %vm737_vm10 = vcmp.eq.s32.totalorder %v1870_v16, %v1918_v46  ;;  %v568_v39 = vadd.f32 %v1455_v37, %v435_v35  ;;  %v1486_v40 = vsel %vm604_vm8, 1.0, %v1799_v29  ;;  %v1487_v41 = vsel %vm605_vm9, 1.0, %v1799_v29 }
  0x47   :  { %1690 = vmatprep.subr.bf16.mxu0 %v1689_v34  ;;  %vm738_vm11 = vcmp.eq.s32.totalorder %v1873_v17, %v1918_v46  ;;  %1724 = vmatprep.subr.bf16.mxu1 %v1689_v34  ;;  %v700_v12 = vadd.f32 %v1486_v40, %v567_v38  ;;  %v1518_v42 = vsel %vm737_vm10, 1.0, %v1799_v29  ;;  %vm870_vm12 = vcmp.eq.s32.totalorder %v1870_v16, %v1920_v47 }
  0x48   :  { %v1519_v43 = vsel %vm738_vm11, 1.0, %v1799_v29  ;;  %v701_v44 = vadd.f32 %v1487_v41, %v568_v39  ;;  %vm871_vm13 = vcmp.eq.s32.totalorder %v1873_v17, %v1920_v47  ;;  %v1550_v45 = vsel %vm870_vm12, 1.0, %v1799_v29 }
  0x49   :  { %vm1003_vm14 = vcmp.eq.s32.totalorder %v1870_v16, %v1922_v48  ;;  %v833_v49 = vadd.f32 %v1518_v42, %v700_v12  ;;  %v1551_v50 = vsel %vm871_vm13, 1.0, %v1799_v29  ;;  %vm1004_vm15 = vcmp.eq.s32.totalorder %v1873_v17, %v1922_v48 }
  0x4a   :  { %v1582_v51 = vsel %vm1003_vm14, 1.0, %v1799_v29  ;;  %v834_v52 = vadd.f32 %v1519_v43, %v701_v44  ;;  %v1583_v53 = vsel %vm1004_vm15, 1.0, %v1799_v29  ;;  %v55_v54 = vadd.s32 168, %v1841_v1 }
  0x4b   :  { %vm90_vm0 = vcmp.eq.s32.totalorder %v1876_v18, %v1878_v19  ;;  %v966_v55 = vadd.f32 %v1550_v45, %v833_v49  ;;  %vm223_vm1 = vcmp.eq.s32.totalorder %v1876_v18, %v1884_v27  ;;  %vm356_vm2 = vcmp.eq.s32.totalorder %v1876_v18, %v1886_v28 }
  0x4c   :  { %v1376_v56 = vsel %vm90_vm0, 1.0, %v1799_v29  ;;  %v967_v16 = vadd.f32 %v1551_v50, %v834_v52  ;;  %vm91_vm3 = vcmp.eq.s32.totalorder %v55_v54, %v1878_v19  ;;  %vm224_vm4 = vcmp.eq.s32.totalorder %v55_v54, %v1884_v27 }
  0x4d   :  { %v1408_v17 = vsel %vm223_vm1, 1.0, %v1799_v29  ;;  %v1099_v57 = vadd.f32 %v1582_v51, %v966_v55  ;;  %v1377_v58 = vsel %vm91_vm3, 1.0, %v1799_v29  ;;  %v1409_v59 = vsel %vm224_vm4, 1.0, %v1799_v29 }
  0x4e   :  { %v319_v60 = vadd.f32 %v1408_v17, %v1376_v56  ;;  %v1100_v61 = vadd.f32 %v1583_v53, %v967_v16  ;;  %v320_v62 = vadd.f32 %v1409_v59, %v1377_v58  ;;  %vm357_vm5 = vcmp.eq.s32.totalorder %v55_v54, %v1886_v28 }
  0x4f   :  { %v1440_v63 = vsel %vm356_vm2, 1.0, %v1799_v29  ;;  %v1441_v0 = vsel %vm357_vm5, 1.0, %v1799_v29  ;;  %vm489_vm6 = vcmp.eq.s32.totalorder %v1876_v18, %v1890_v32  ;;  %vm490_vm7 = vcmp.eq.s32.totalorder %v55_v54, %v1890_v32 }
  0x50   :  { %v452_v2 = vadd.f32 %v1440_v63, %v319_v60  ;;  %v1691_v3 = vpack.c.bf16 %v1100_v61, %v1099_v57  ;;  %v453_v4 = vadd.f32 %v1441_v0, %v320_v62  ;;  %v1472_v5 = vsel %vm489_vm6, 1.0, %v1799_v29 }
  0x51   :  { %v1473_v6 = vsel %vm490_vm7, 1.0, %v1799_v29  ;;  %vm622_vm8 = vcmp.eq.s32.totalorder %v1876_v18, %v1892_v33  ;;  %vm623_vm9 = vcmp.eq.s32.totalorder %v55_v54, %v1892_v33  ;;  %vm755_vm10 = vcmp.eq.s32.totalorder %v1876_v18, %v1918_v46 }
  0x52   :  { %v585_v7 = vadd.f32 %v1472_v5, %v452_v2  ;;  %1692 = vmatpush3.bf16.msra.mxu0 %v1691_v3  ;;  %v586_v8 = vadd.f32 %v1473_v6, %v453_v4  ;;  %v1504_v9 = vsel %vm622_vm8, 1.0, %v1799_v29  ;;  %v1505_v10 = vsel %vm623_vm9, 1.0, %v1799_v29  ;;  %1732 = vmatpush3.bf16.msra.mxu1 %v1691_v3 }
  0x53   :  { %vm756_vm11 = vcmp.eq.s32.totalorder %v55_v54, %v1918_v46  ;;  %v1536_v13 = vsel %vm755_vm10, 1.0, %v1799_v29  ;;  %vm888_vm12 = vcmp.eq.s32.totalorder %v1876_v18, %v1920_v47  ;;  %vm889_vm13 = vcmp.eq.s32.totalorder %v55_v54, %v1920_v47 }
  0x54   :  { %v718_v11 = vadd.f32 %v1504_v9, %v585_v7  ;;  %v1537_v15 = vsel %vm756_vm11, 1.0, %v1799_v29  ;;  %v719_v14 = vadd.f32 %v1505_v10, %v586_v8  ;;  %v1568_v20 = vsel %vm888_vm12, 1.0, %v1799_v29  ;;  %v1130_v9 = vld [vmem:[#allocation2 + $0x8] sm:$0xff] }
  0x55   :  { %vm1021_vm14 = vcmp.eq.s32.totalorder %v1876_v18, %v1922_v48  ;;  %v1569_v22 = vsel %vm889_vm13, 1.0, %v1799_v29  ;;  %vm1022_vm15 = vcmp.eq.s32.totalorder %v55_v54, %v1922_v48  ;;  %v38_v26 = vadd.s32 32, %v1841_v1  ;;  %1209 = vmatprep.mubr.f32.mxu0 %v1130_v9 }
  0x56   :  { %v851_v21 = vadd.f32 %v1536_v13, %v718_v11  ;;  %v1600_v23 = vsel %vm1021_vm14, 1.0, %v1799_v29  ;;  %v852_v24 = vadd.f32 %v1537_v15, %v719_v14  ;;  %v1601_v25 = vsel %vm1022_vm15, 1.0, %v1799_v29 }
  0x57   :  { %v39_v30 = vadd.s32 40, %v1841_v1  ;;  %v2133_v34 = vadd.s32 176, %v1841_v1  ;;  %v2136_v18 = vadd.s32 184, %v1841_v1  ;;  %v2139_v35 = vadd.s32 48, %v1841_v1 }
  0x58   :  { %v984_v31 = vadd.f32 %v1568_v20, %v851_v21  ;;  %v985_v36 = vadd.f32 %v1569_v22, %v852_v24  ;;  %vm74_vm0 = vcmp.eq.s32.totalorder %v38_v26, %v1878_v19  ;;  %vm207_vm2 = vcmp.eq.s32.totalorder %v38_v26, %v1884_v27 }
  0x59   :  { %vm75_vm1 = vcmp.eq.s32.totalorder %v39_v30, %v1878_v19  ;;  %v1360_v38 = vsel %vm74_vm0, 1.0, %v1799_v29  ;;  %vm208_vm3 = vcmp.eq.s32.totalorder %v39_v30, %v1884_v27  ;;  %v1392_v41 = vsel %vm207_vm2, 1.0, %v1799_v29 }
  0x5a   :  { %v1117_v37 = vadd.f32 %v1600_v23, %v984_v31  ;;  %v1361_v39 = vsel %vm75_vm1, 1.0, %v1799_v29  ;;  %v1118_v40 = vadd.f32 %v1601_v25, %v985_v36  ;;  %v1393_v12 = vsel %vm208_vm3, 1.0, %v1799_v29 }
  0x5b   :  { %vm340_vm4 = vcmp.eq.s32.totalorder %v38_v26, %v1886_v28  ;;  %v303_v42 = vadd.f32 %v1392_v41, %v1360_v38  ;;  %v304_v43 = vadd.f32 %v1393_v12, %v1361_v39  ;;  %vm341_vm5 = vcmp.eq.s32.totalorder %v39_v30, %v1886_v28 }
  0x5c   :  { %v1424_v44 = vsel %vm340_vm4, 1.0, %v1799_v29  ;;  %v1693_v45 = vpack.c.bf16 %v1118_v40, %v1117_v37  ;;  %v1425_v49 = vsel %vm341_vm5, 1.0, %v1799_v29  ;;  %vm473_vm6 = vcmp.eq.s32.totalorder %v38_v26, %v1890_v32 }
  0x5d   :  { %vm474_vm7 = vcmp.eq.s32.totalorder %v39_v30, %v1890_v32  ;;  %v436_v50 = vadd.f32 %v1424_v44, %v303_v42  ;;  %v437_v51 = vadd.f32 %v1425_v49, %v304_v43  ;;  %v1456_v52 = vsel %vm473_vm6, 1.0, %v1799_v29 }
  0x5e   :  { %v1457_v53 = vsel %vm474_vm7, 1.0, %v1799_v29  ;;  %1694 = vmatprep.subr.bf16.mxu0 %v1693_v45  ;;  %vm606_vm8 = vcmp.eq.s32.totalorder %v38_v26, %v1892_v33  ;;  %vm607_vm9 = vcmp.eq.s32.totalorder %v39_v30, %v1892_v33  ;;  %vm739_vm10 = vcmp.eq.s32.totalorder %v38_v26, %v1918_v46  ;;  %1725 = vmatprep.subr.bf16.mxu1 %v1693_v45 }
  0x5f   :  { %vm740_vm11 = vcmp.eq.s32.totalorder %v39_v30, %v1918_v46  ;;  %v569_v54 = vadd.f32 %v1456_v52, %v436_v50  ;;  %v570_v55 = vadd.f32 %v1457_v53, %v437_v51  ;;  %v1488_v56 = vsel %vm606_vm8, 1.0, %v1799_v29 }
  0x60   :  { %v1489_v16 = vsel %vm607_vm9, 1.0, %v1799_v29  ;;  %v1520_v17 = vsel %vm739_vm10, 1.0, %v1799_v29  ;;  %v1521_v57 = vsel %vm740_vm11, 1.0, %v1799_v29  ;;  %vm872_vm12 = vcmp.eq.s32.totalorder %v38_v26, %v1920_v47 }
  0x61   :  { %vm873_vm13 = vcmp.eq.s32.totalorder %v39_v30, %v1920_v47  ;;  %v702_v58 = vadd.f32 %v1488_v56, %v569_v54  ;;  %v703_v59 = vadd.f32 %v1489_v16, %v570_v55  ;;  %v1552_v60 = vsel %vm872_vm12, 1.0, %v1799_v29 }
  0x62   :  { %v1553_v61 = vsel %vm873_vm13, 1.0, %v1799_v29  ;;  %vm1005_vm14 = vcmp.eq.s32.totalorder %v38_v26, %v1922_v48  ;;  %vm1006_vm15 = vcmp.eq.s32.totalorder %v39_v30, %v1922_v48  ;;  %vm92_vm0 = vcmp.eq.s32.totalorder %v2133_v34, %v1878_v19  ;;  %v1140_v26 = vld [vmem:[#allocation2 + $0x58] sm:$0xff] }
  0x63   :  { %vm93_vm1 = vcmp.eq.s32.totalorder %v2136_v18, %v1878_v19  ;;  %v835_v62 = vadd.f32 %v1520_v17, %v702_v58  ;;  %v836_v63 = vadd.f32 %v1521_v57, %v703_v59  ;;  %v1584_v0 = vsel %vm1005_vm14, 1.0, %v1799_v29  ;;  %1234 = vmatprep.mubr.f32.mxu1 %v1140_v26 }
  0x64   :  { %v1585_v2 = vsel %vm1006_vm15, 1.0, %v1799_v29  ;;  %v1378_v3 = vsel %vm92_vm0, 1.0, %v1799_v29  ;;  %v1379_v4 = vsel %vm93_vm1, 1.0, %v1799_v29  ;;  %vm225_vm2 = vcmp.eq.s32.totalorder %v2133_v34, %v1884_v27 }
  0x65   :  { %vm226_vm3 = vcmp.eq.s32.totalorder %v2136_v18, %v1884_v27  ;;  %v968_v5 = vadd.f32 %v1552_v60, %v835_v62  ;;  %v969_v6 = vadd.f32 %v1553_v61, %v836_v63  ;;  %v1410_v7 = vsel %vm225_vm2, 1.0, %v1799_v29 }
  0x66   :  { %v1411_v8 = vsel %vm226_vm3, 1.0, %v1799_v29  ;;  %v321_v10 = vadd.f32 %v1410_v7, %v1378_v3  ;;  %vm358_vm4 = vcmp.eq.s32.totalorder %v2133_v34, %v1886_v28  ;;  %vm359_vm5 = vcmp.eq.s32.totalorder %v2136_v18, %v1886_v28 }
  0x67   :  { %v322_v11 = vadd.f32 %v1411_v8, %v1379_v4  ;;  %v1101_v13 = vadd.f32 %v1584_v0, %v968_v5  ;;  %v1102_v15 = vadd.f32 %v1585_v2, %v969_v6  ;;  %v1442_v14 = vsel %vm358_vm4, 1.0, %v1799_v29 }
  0x68   :  { %v1443_v20 = vsel %vm359_vm5, 1.0, %v1799_v29  ;;  %v454_v21 = vadd.f32 %v1442_v14, %v321_v10  ;;  %vm491_vm6 = vcmp.eq.s32.totalorder %v2133_v34, %v1890_v32  ;;  %vm492_vm7 = vcmp.eq.s32.totalorder %v2136_v18, %v1890_v32 }
  0x69   :  { %v455_v22 = vadd.f32 %v1443_v20, %v322_v11  ;;  %v1695_v23 = vpack.c.bf16 %v1102_v15, %v1101_v13  ;;  %v1474_v24 = vsel %vm491_vm6, 1.0, %v1799_v29  ;;  %v1475_v25 = vsel %vm492_vm7, 1.0, %v1799_v29 }
  0x6a   :  { %vm624_vm8 = vcmp.eq.s32.totalorder %v2133_v34, %v1892_v33  ;;  %v587_v30 = vadd.f32 %v1474_v24, %v454_v21  ;;  %vm625_vm9 = vcmp.eq.s32.totalorder %v2136_v18, %v1892_v33  ;;  %vm757_vm10 = vcmp.eq.s32.totalorder %v2133_v34, %v1918_v46 }
  0x6b   :  { %v588_v31 = vadd.f32 %v1475_v25, %v455_v22  ;;  %v1506_v36 = vsel %vm624_vm8, 1.0, %v1799_v29  ;;  %1696 = vmatpush3.bf16.msra.mxu0 %v1695_v23  ;;  %v1507_v37 = vsel %vm625_vm9, 1.0, %v1799_v29  ;;  %vm758_vm11 = vcmp.eq.s32.totalorder %v2136_v18, %v1918_v46  ;;  %1733 = vmatpush3.bf16.msra.mxu1 %v1695_v23 }
  0x6c   :  { %vm890_vm12 = vcmp.eq.s32.totalorder %v2133_v34, %v1920_v47  ;;  %v720_v38 = vadd.f32 %v1506_v36, %v587_v30  ;;  %v1538_v40 = vsel %vm757_vm10, 1.0, %v1799_v29  ;;  %v1539_v41 = vsel %vm758_vm11, 1.0, %v1799_v29 }
  0x6d   :  { %v721_v39 = vadd.f32 %v1507_v37, %v588_v31  ;;  %vm891_vm13 = vcmp.eq.s32.totalorder %v2136_v18, %v1920_v47  ;;  %v1570_v12 = vsel %vm890_vm12, 1.0, %v1799_v29  ;;  %vm1023_vm14 = vcmp.eq.s32.totalorder %v2133_v34, %v1922_v48 }
  0x6e   :  { %vm1024_vm15 = vcmp.eq.s32.totalorder %v2136_v18, %v1922_v48  ;;  %v853_v42 = vadd.f32 %v1538_v40, %v720_v38  ;;  %v1571_v44 = vsel %vm891_vm13, 1.0, %v1799_v29  ;;  %v1602_v45 = vsel %vm1023_vm14, 1.0, %v1799_v29 }
  0x6f   :  { %v854_v43 = vadd.f32 %v1539_v41, %v721_v39  ;;  %v1603_v49 = vsel %vm1024_vm15, 1.0, %v1799_v29  ;;  %v41_v50 = vadd.s32 56, %v1841_v1  ;;  %vm76_vm0 = vcmp.eq.s32.totalorder %v2139_v35, %v1878_v19 }
  0x70   :  { %vm209_vm1 = vcmp.eq.s32.totalorder %v2139_v35, %v1884_v27  ;;  %v986_v34 = vadd.f32 %v1570_v12, %v853_v42  ;;  %v1362_v18 = vsel %vm76_vm0, 1.0, %v1799_v29  ;;  %vm342_vm4 = vcmp.eq.s32.totalorder %v2139_v35, %v1886_v28 }
  0x71   :  { %v987_v51 = vadd.f32 %v1571_v44, %v854_v43  ;;  %v1394_v52 = vsel %vm209_vm1, 1.0, %v1799_v29  ;;  %vm77_vm2 = vcmp.eq.s32.totalorder %v41_v50, %v1878_v19  ;;  %vm210_vm3 = vcmp.eq.s32.totalorder %v41_v50, %v1884_v27 }
  0x72   :  { %v305_v53 = vadd.f32 %v1394_v52, %v1362_v18  ;;  %v1119_v54 = vadd.f32 %v1602_v45, %v986_v34  ;;  %v1363_v56 = vsel %vm77_vm2, 1.0, %v1799_v29  ;;  %v1395_v16 = vsel %vm210_vm3, 1.0, %v1799_v29 }
  0x73   :  { %v1120_v55 = vadd.f32 %v1603_v49, %v987_v51  ;;  %v306_v17 = vadd.f32 %v1395_v16, %v1363_v56  ;;  %vm343_vm5 = vcmp.eq.s32.totalorder %v41_v50, %v1886_v28  ;;  %v1426_v57 = vsel %vm342_vm4, 1.0, %v1799_v29 }
  0x74   :  { %vm475_vm6 = vcmp.eq.s32.totalorder %v2139_v35, %v1890_v32  ;;  %v1427_v59 = vsel %vm343_vm5, 1.0, %v1799_v29  ;;  %v438_v60 = vadd.f32 %v1426_v57, %v305_v53  ;;  %vm476_vm7 = vcmp.eq.s32.totalorder %v41_v50, %v1890_v32 }
  0x75   :  { %v1697_v58 = vpack.c.bf16 %v1120_v55, %v1119_v54  ;;  %v439_v61 = vadd.f32 %v1427_v59, %v306_v17  ;;  %v1458_v62 = vsel %vm475_vm6, 1.0, %v1799_v29  ;;  %v1459_v63 = vsel %vm476_vm7, 1.0, %v1799_v29 }
  0x76   :  { %vm608_vm8 = vcmp.eq.s32.totalorder %v2139_v35, %v1892_v33  ;;  %v571_v0 = vadd.f32 %v1458_v62, %v438_v60  ;;  %vm609_vm9 = vcmp.eq.s32.totalorder %v41_v50, %v1892_v33  ;;  %vm741_vm10 = vcmp.eq.s32.totalorder %v2139_v35, %v1918_v46 }
  0x77   :  { %1698 = vmatprep.subr.bf16.mxu0 %v1697_v58  ;;  %v1490_v2 = vsel %vm608_vm8, 1.0, %v1799_v29  ;;  %1726 = vmatprep.subr.bf16.mxu1 %v1697_v58  ;;  %v572_v3 = vadd.f32 %v1459_v63, %v439_v61  ;;  %v1491_v4 = vsel %vm609_vm9, 1.0, %v1799_v29  ;;  %vm742_vm11 = vcmp.eq.s32.totalorder %v41_v50, %v1918_v46 }
  0x78   :  { %v1522_v5 = vsel %vm741_vm10, 1.0, %v1799_v29  ;;  %v704_v6 = vadd.f32 %v1490_v2, %v571_v0  ;;  %v1523_v7 = vsel %vm742_vm11, 1.0, %v1799_v29  ;;  %vm874_vm12 = vcmp.eq.s32.totalorder %v2139_v35, %v1920_v47 }
  0x79   :  { %vm875_vm13 = vcmp.eq.s32.totalorder %v41_v50, %v1920_v47  ;;  %v705_v8 = vadd.f32 %v1491_v4, %v572_v3  ;;  %v1554_v9 = vsel %vm874_vm12, 1.0, %v1799_v29  ;;  %vm1007_vm14 = vcmp.eq.s32.totalorder %v2139_v35, %v1922_v48 }
  0x7a   :  { %v1555_v10 = vsel %vm875_vm13, 1.0, %v1799_v29  ;;  %v837_v11 = vadd.f32 %v1522_v5, %v704_v6  ;;  %vm1008_vm15 = vcmp.eq.s32.totalorder %v41_v50, %v1922_v48  ;;  %v1586_v13 = vsel %vm1007_vm14, 1.0, %v1799_v29 }
  0x7b   :  { %v58_v15 = vadd.s32 192, %v1841_v1  ;;  %v838_v14 = vadd.f32 %v1523_v7, %v705_v8  ;;  %v1587_v20 = vsel %vm1008_vm15, 1.0, %v1799_v29  ;;  %v59_v21 = vadd.s32 200, %v1841_v1 }
  0x7c   :  { %v2265_v22 = vadd.s32 64, %v1841_v1  ;;  %v970_v23 = vadd.f32 %v1554_v9, %v837_v11  ;;  %v43_v56 = vadd.s32 72, %v1841_v1 }
  0x7d   :  { %vm94_vm0 = vcmp.eq.s32.totalorder %v58_v15, %v1878_v19  ;;  %vm227_vm1 = vcmp.eq.s32.totalorder %v58_v15, %v1884_v27  ;;  %vm360_vm2 = vcmp.eq.s32.totalorder %v58_v15, %v1886_v28  ;;  %v971_v35 = vadd.f32 %v1555_v10, %v838_v14 }
  0x7e   :  { %vm95_vm3 = vcmp.eq.s32.totalorder %v59_v21, %v1878_v19  ;;  %v1380_v24 = vsel %vm94_vm0, 1.0, %v1799_v29  ;;  %vm228_vm4 = vcmp.eq.s32.totalorder %v59_v21, %v1884_v27  ;;  %v1103_v25 = vadd.f32 %v1586_v13, %v970_v23 }
  0x7f   :  { %v1381_v26 = vsel %vm95_vm3, 1.0, %v1799_v29  ;;  %v1412_v30 = vsel %vm227_vm1, 1.0, %v1799_v29  ;;  %v1413_v31 = vsel %vm228_vm4, 1.0, %v1799_v29  ;;  %v1104_v36 = vadd.f32 %v1587_v20, %v971_v35 }
  0x80   :  { %v323_v37 = vadd.f32 %v1412_v30, %v1380_v24  ;;  %v324_v38 = vadd.f32 %v1413_v31, %v1381_v26  ;;  %vm361_vm5 = vcmp.eq.s32.totalorder %v59_v21, %v1886_v28  ;;  %v1444_v39 = vsel %vm360_vm2, 1.0, %v1799_v29 }
  0x81   :  { %v1445_v40 = vsel %vm361_vm5, 1.0, %v1799_v29  ;;  %vm493_vm6 = vcmp.eq.s32.totalorder %v58_v15, %v1890_v32  ;;  %vm494_vm7 = vcmp.eq.s32.totalorder %v59_v21, %v1890_v32  ;;  %v1699_v41 = vpack.c.bf16 %v1104_v36, %v1103_v25 }
  0x82   :  { %v456_v12 = vadd.f32 %v1444_v39, %v323_v37  ;;  %v457_v42 = vadd.f32 %v1445_v40, %v324_v38  ;;  %v1476_v43 = vsel %vm493_vm6, 1.0, %v1799_v29  ;;  %v1477_v44 = vsel %vm494_vm7, 1.0, %v1799_v29 }
  0x83   :  { %vm626_vm8 = vcmp.eq.s32.totalorder %v58_v15, %v1892_v33  ;;  %vm627_vm9 = vcmp.eq.s32.totalorder %v59_v21, %v1892_v33  ;;  %vm759_vm10 = vcmp.eq.s32.totalorder %v58_v15, %v1918_v46  ;;  %1700 = vmatpush3.bf16.msra.mxu0 %v1699_v41  ;;  %1734 = vmatpush3.bf16.msra.mxu1 %v1699_v41  ;;  %v60_v31 = vadd.s32 208, %v1841_v1 }
  0x84   :  { %v589_v45 = vadd.f32 %v1476_v43, %v456_v12  ;;  %v590_v49 = vadd.f32 %v1477_v44, %v457_v42  ;;  %v1508_v50 = vsel %vm626_vm8, 1.0, %v1799_v29  ;;  %v1509_v34 = vsel %vm627_vm9, 1.0, %v1799_v29 }
  0x85   :  { %vm760_vm11 = vcmp.eq.s32.totalorder %v59_v21, %v1918_v46  ;;  %v1540_v51 = vsel %vm759_vm10, 1.0, %v1799_v29  ;;  %vm892_vm12 = vcmp.eq.s32.totalorder %v58_v15, %v1920_v47  ;;  %vm893_vm13 = vcmp.eq.s32.totalorder %v59_v21, %v1920_v47 }
  0x86   :  { %v722_v18 = vadd.f32 %v1508_v50, %v589_v45  ;;  %v723_v52 = vadd.f32 %v1509_v34, %v590_v49  ;;  %v1541_v53 = vsel %vm760_vm11, 1.0, %v1799_v29  ;;  %v1572_v54 = vsel %vm892_vm12, 1.0, %v1799_v29 }
  0x87   :  { %v1573_v55 = vsel %vm893_vm13, 1.0, %v1799_v29  ;;  %vm1025_vm14 = vcmp.eq.s32.totalorder %v58_v15, %v1922_v48  ;;  %vm1026_vm15 = vcmp.eq.s32.totalorder %v59_v21, %v1922_v48  ;;  %vm78_vm0 = vcmp.eq.s32.totalorder %v2265_v22, %v1878_v19 }
  0x88   :  { %v855_v16 = vadd.f32 %v1540_v51, %v722_v18  ;;  %v856_v17 = vadd.f32 %v1541_v53, %v723_v52  ;;  %v1604_v57 = vsel %vm1025_vm14, 1.0, %v1799_v29  ;;  %v1605_v58 = vsel %vm1026_vm15, 1.0, %v1799_v29 }
  0x89   :  { %vm79_vm1 = vcmp.eq.s32.totalorder %v43_v56, %v1878_v19  ;;  %vm211_vm2 = vcmp.eq.s32.totalorder %v2265_v22, %v1884_v27  ;;  %vm212_vm3 = vcmp.eq.s32.totalorder %v43_v56, %v1884_v27  ;;  %v1364_v61 = vsel %vm78_vm0, 1.0, %v1799_v29 }
  0x8a   :  { %v988_v59 = vadd.f32 %v1572_v54, %v855_v16  ;;  %v989_v60 = vadd.f32 %v1573_v55, %v856_v17  ;;  %v1365_v62 = vsel %vm79_vm1, 1.0, %v1799_v29  ;;  %v1396_v63 = vsel %vm211_vm2, 1.0, %v1799_v29 }
  0x8b   :  { %v1397_v0 = vsel %vm212_vm3, 1.0, %v1799_v29  ;;  %vm344_vm4 = vcmp.eq.s32.totalorder %v2265_v22, %v1886_v28  ;;  %vm345_vm5 = vcmp.eq.s32.totalorder %v43_v56, %v1886_v28  ;;  %v307_v4 = vadd.f32 %v1396_v63, %v1364_v61 }
  0x8c   :  { %v1121_v2 = vadd.f32 %v1604_v57, %v988_v59  ;;  %v1122_v3 = vadd.f32 %v1605_v58, %v989_v60  ;;  %v308_v5 = vadd.f32 %v1397_v0, %v1365_v62  ;;  %v1428_v6 = vsel %vm344_vm4, 1.0, %v1799_v29 }
  0x8d   :  { %v1429_v7 = vsel %vm345_vm5, 1.0, %v1799_v29  ;;  %vm477_vm6 = vcmp.eq.s32.totalorder %v2265_v22, %v1890_v32  ;;  %vm478_vm7 = vcmp.eq.s32.totalorder %v43_v56, %v1890_v32  ;;  %v440_v9 = vadd.f32 %v1428_v6, %v307_v4 }
  0x8e   :  { %v1701_v8 = vpack.c.bf16 %v1122_v3, %v1121_v2  ;;  %v441_v10 = vadd.f32 %v1429_v7, %v308_v5  ;;  %v1460_v11 = vsel %vm477_vm6, 1.0, %v1799_v29  ;;  %v1461_v13 = vsel %vm478_vm7, 1.0, %v1799_v29 }
  0x8f   :  { %vm610_vm8 = vcmp.eq.s32.totalorder %v2265_v22, %v1892_v33  ;;  %vm611_vm9 = vcmp.eq.s32.totalorder %v43_v56, %v1892_v33  ;;  %vm743_vm10 = vcmp.eq.s32.totalorder %v2265_v22, %v1918_v46  ;;  %v573_v15 = vadd.f32 %v1460_v11, %v440_v9 }
  0x90   :  { %1702 = vmatprep.subr.bf16.mxu0 %v1701_v8  ;;  %v574_v14 = vadd.f32 %v1461_v13, %v441_v10  ;;  %v1492_v20 = vsel %vm610_vm8, 1.0, %v1799_v29  ;;  %v1493_v21 = vsel %vm611_vm9, 1.0, %v1799_v29  ;;  %1727 = vmatprep.subr.bf16.mxu1 %v1701_v8  ;;  %vm744_vm11 = vcmp.eq.s32.totalorder %v43_v56, %v1918_v46 }
  0x91   :  { %v1524_v23 = vsel %vm743_vm10, 1.0, %v1799_v29  ;;  %vm876_vm12 = vcmp.eq.s32.totalorder %v2265_v22, %v1920_v47  ;;  %vm877_vm13 = vcmp.eq.s32.totalorder %v43_v56, %v1920_v47  ;;  %v706_v35 = vadd.f32 %v1492_v20, %v573_v15 }
  0x92   :  { %v707_v24 = vadd.f32 %v1493_v21, %v574_v14  ;;  %v1525_v25 = vsel %vm744_vm11, 1.0, %v1799_v29  ;;  %v1556_v26 = vsel %vm876_vm12, 1.0, %v1799_v29  ;;  %v1557_v30 = vsel %vm877_vm13, 1.0, %v1799_v29 }
  0x93   :  { %vm1009_vm14 = vcmp.eq.s32.totalorder %v2265_v22, %v1922_v48  ;;  %vm1010_vm15 = vcmp.eq.s32.totalorder %v43_v56, %v1922_v48  ;;  %v839_v36 = vadd.f32 %v1524_v23, %v706_v35  ;;  %v61_v40 = vadd.s32 216, %v1841_v1 }
  0x94   :  { %v840_v37 = vadd.f32 %v1525_v25, %v707_v24  ;;  %v1588_v38 = vsel %vm1009_vm14, 1.0, %v1799_v29  ;;  %v1589_v39 = vsel %vm1010_vm15, 1.0, %v1799_v29  ;;  %vm96_vm0 = vcmp.eq.s32.totalorder %v60_v31, %v1878_v19 }
  0x95   :  { %vm229_vm1 = vcmp.eq.s32.totalorder %v60_v31, %v1884_v27  ;;  %vm362_vm2 = vcmp.eq.s32.totalorder %v60_v31, %v1886_v28  ;;  %v972_v41 = vadd.f32 %v1556_v26, %v839_v36  ;;  %v1382_v12 = vsel %vm96_vm0, 1.0, %v1799_v29 }
  0x96   :  { %v973_v22 = vadd.f32 %v1557_v30, %v840_v37  ;;  %v1414_v42 = vsel %vm229_vm1, 1.0, %v1799_v29  ;;  %vm97_vm3 = vcmp.eq.s32.totalorder %v61_v40, %v1878_v19  ;;  %vm230_vm4 = vcmp.eq.s32.totalorder %v61_v40, %v1884_v27 }
  0x97   :  { %v325_v43 = vadd.f32 %v1414_v42, %v1382_v12  ;;  %vm363_vm5 = vcmp.eq.s32.totalorder %v61_v40, %v1886_v28  ;;  %v1105_v44 = vadd.f32 %v1588_v38, %v972_v41  ;;  %v1383_v49 = vsel %vm97_vm3, 1.0, %v1799_v29 }
  0x98   :  { %v1106_v45 = vadd.f32 %v1589_v39, %v973_v22  ;;  %v1415_v50 = vsel %vm230_vm4, 1.0, %v1799_v29  ;;  %v1446_v51 = vsel %vm362_vm2, 1.0, %v1799_v29  ;;  %v1447_v18 = vsel %vm363_vm5, 1.0, %v1799_v29 }
  0x99   :  { %v326_v34 = vadd.f32 %v1415_v50, %v1383_v49  ;;  %vm495_vm6 = vcmp.eq.s32.totalorder %v60_v31, %v1890_v32  ;;  %v458_v53 = vadd.f32 %v1446_v51, %v325_v43  ;;  %vm496_vm7 = vcmp.eq.s32.totalorder %v61_v40, %v1890_v32 }
  0x9a   :  { %v1703_v52 = vpack.c.bf16 %v1106_v45, %v1105_v44  ;;  %v1478_v54 = vsel %vm495_vm6, 1.0, %v1799_v29  ;;  %v1479_v56 = vsel %vm496_vm7, 1.0, %v1799_v29  ;;  %vm628_vm8 = vcmp.eq.s32.totalorder %v60_v31, %v1892_v33 }
  0x9b   :  { %v459_v55 = vadd.f32 %v1447_v18, %v326_v34  ;;  %vm629_vm9 = vcmp.eq.s32.totalorder %v61_v40, %v1892_v33  ;;  %v591_v16 = vadd.f32 %v1478_v54, %v458_v53  ;;  %v1510_v17 = vsel %vm628_vm8, 1.0, %v1799_v29 }
  0x9c   :  { %1704 = vmatpush3.bf16.msra.mxu0 %v1703_v52  ;;  %v1511_v57 = vsel %vm629_vm9, 1.0, %v1799_v29  ;;  %vm761_vm10 = vcmp.eq.s32.totalorder %v60_v31, %v1918_v46  ;;  %1735 = vmatpush3.bf16.msra.mxu1 %v1703_v52  ;;  %vm762_vm11 = vcmp.eq.s32.totalorder %v61_v40, %v1918_v46  ;;  %vm894_vm12 = vcmp.eq.s32.totalorder %v60_v31, %v1920_v47 }
  0x9d   :  { %v592_v58 = vadd.f32 %v1479_v56, %v459_v55  ;;  %v1542_v59 = vsel %vm761_vm10, 1.0, %v1799_v29  ;;  %v724_v60 = vadd.f32 %v1510_v17, %v591_v16  ;;  %v1543_v61 = vsel %vm762_vm11, 1.0, %v1799_v29 }
  0x9e   :  { %vm895_vm13 = vcmp.eq.s32.totalorder %v61_v40, %v1920_v47  ;;  %v1574_v62 = vsel %vm894_vm12, 1.0, %v1799_v29  ;;  %vm1027_vm14 = vcmp.eq.s32.totalorder %v60_v31, %v1922_v48  ;;  %vm1028_vm15 = vcmp.eq.s32.totalorder %v61_v40, %v1922_v48 }
  0x9f   :  { %v725_v63 = vadd.f32 %v1511_v57, %v592_v58  ;;  %v1575_v0 = vsel %vm895_vm13, 1.0, %v1799_v29  ;;  %v857_v2 = vadd.f32 %v1542_v59, %v724_v60  ;;  %v1606_v3 = vsel %vm1027_vm14, 1.0, %v1799_v29 }
  0xa0   :  { %v1607_v4 = vsel %vm1028_vm15, 1.0, %v1799_v29  ;;  %v44_v5 = vadd.s32 80, %v1841_v1  ;;  %v45_v7 = vadd.s32 88, %v1841_v1  ;;  %v2377_v8 = vadd.s32 224, %v1841_v1 }
  0xa1   :  { %v858_v6 = vadd.f32 %v1543_v61, %v725_v63  ;;  %v2380_v9 = vadd.s32 232, %v1841_v1  ;;  %v990_v10 = vadd.f32 %v1574_v62, %v857_v2 }
  0xa2   :  { %vm80_vm0 = vcmp.eq.s32.totalorder %v44_v5, %v1878_v19  ;;  %vm213_vm1 = vcmp.eq.s32.totalorder %v44_v5, %v1884_v27  ;;  %vm346_vm2 = vcmp.eq.s32.totalorder %v44_v5, %v1886_v28  ;;  %vm81_vm3 = vcmp.eq.s32.totalorder %v45_v7, %v1878_v19 }
  0xa3   :  { %v991_v11 = vadd.f32 %v1575_v0, %v858_v6  ;;  %v1366_v13 = vsel %vm80_vm0, 1.0, %v1799_v29  ;;  %vm214_vm4 = vcmp.eq.s32.totalorder %v45_v7, %v1884_v27  ;;  %v1123_v15 = vadd.f32 %v1606_v3, %v990_v10 }
  0xa4   :  { %v1367_v14 = vsel %vm81_vm3, 1.0, %v1799_v29  ;;  %v1398_v20 = vsel %vm213_vm1, 1.0, %v1799_v29  ;;  %v1399_v21 = vsel %vm214_vm4, 1.0, %v1799_v29  ;;  %vm347_vm5 = vcmp.eq.s32.totalorder %v45_v7, %v1886_v28 }
  0xa5   :  { %v1124_v23 = vadd.f32 %v1607_v4, %v991_v11  ;;  %v309_v35 = vadd.f32 %v1398_v20, %v1366_v13  ;;  %v310_v24 = vadd.f32 %v1399_v21, %v1367_v14  ;;  %v1430_v25 = vsel %vm346_vm2, 1.0, %v1799_v29 }
  0xa6   :  { %v1431_v26 = vsel %vm347_vm5, 1.0, %v1799_v29  ;;  %vm479_vm6 = vcmp.eq.s32.totalorder %v44_v5, %v1890_v32  ;;  %vm480_vm7 = vcmp.eq.s32.totalorder %v45_v7, %v1890_v32  ;;  %vm612_vm8 = vcmp.eq.s32.totalorder %v44_v5, %v1892_v33 }
  0xa7   :  { %v1705_v30 = vpack.c.bf16 %v1124_v23, %v1123_v15  ;;  %v442_v31 = vadd.f32 %v1430_v25, %v309_v35  ;;  %v443_v36 = vadd.f32 %v1431_v26, %v310_v24  ;;  %v1462_v37 = vsel %vm479_vm6, 1.0, %v1799_v29 }
  0xa8   :  { %v1463_v38 = vsel %vm480_vm7, 1.0, %v1799_v29  ;;  %vm613_vm9 = vcmp.eq.s32.totalorder %v45_v7, %v1892_v33  ;;  %vm745_vm10 = vcmp.eq.s32.totalorder %v44_v5, %v1918_v46  ;;  %v1494_v41 = vsel %vm612_vm8, 1.0, %v1799_v29 }
  0xa9   :  { %1706 = vmatprep.subr.bf16.mxu0 %v1705_v30  ;;  %v575_v39 = vadd.f32 %v1462_v37, %v442_v31  ;;  %v576_v40 = vadd.f32 %v1463_v38, %v443_v36  ;;  %v1495_v22 = vsel %vm613_vm9, 1.0, %v1799_v29  ;;  %1728 = vmatprep.subr.bf16.mxu1 %v1705_v30  ;;  %vm746_vm11 = vcmp.eq.s32.totalorder %v45_v7, %v1918_v46 }
  0xaa   :  { %v1526_v12 = vsel %vm745_vm10, 1.0, %v1799_v29  ;;  %vm878_vm12 = vcmp.eq.s32.totalorder %v44_v5, %v1920_v47  ;;  %vm879_vm13 = vcmp.eq.s32.totalorder %v45_v7, %v1920_v47  ;;  %v1527_v44 = vsel %vm746_vm11, 1.0, %v1799_v29 }
  0xab   :  { %v708_v42 = vadd.f32 %v1494_v41, %v575_v39  ;;  %v709_v43 = vadd.f32 %v1495_v22, %v576_v40  ;;  %v1558_v45 = vsel %vm878_vm12, 1.0, %v1799_v29  ;;  %v1559_v49 = vsel %vm879_vm13, 1.0, %v1799_v29 }
  0xac   :  { %vm1011_vm14 = vcmp.eq.s32.totalorder %v44_v5, %v1922_v48  ;;  %vm1012_vm15 = vcmp.eq.s32.totalorder %v45_v7, %v1922_v48  ;;  %vm98_vm0 = vcmp.eq.s32.totalorder %v2377_v8, %v1878_v19  ;;  %vm99_vm1 = vcmp.eq.s32.totalorder %v2380_v9, %v1878_v19 }
  0xad   :  { %v841_v50 = vadd.f32 %v1526_v12, %v708_v42  ;;  %v842_v34 = vadd.f32 %v1527_v44, %v709_v43  ;;  %v1590_v51 = vsel %vm1011_vm14, 1.0, %v1799_v29  ;;  %v1591_v18 = vsel %vm1012_vm15, 1.0, %v1799_v29 }
  0xae   :  { %v1384_v52 = vsel %vm98_vm0, 1.0, %v1799_v29  ;;  %vm231_vm2 = vcmp.eq.s32.totalorder %v2377_v8, %v1884_v27  ;;  %vm232_vm3 = vcmp.eq.s32.totalorder %v2380_v9, %v1884_v27  ;;  %v1385_v55 = vsel %vm99_vm1, 1.0, %v1799_v29 }
  0xaf   :  { %v974_v53 = vadd.f32 %v1558_v45, %v841_v50  ;;  %v975_v54 = vadd.f32 %v1559_v49, %v842_v34  ;;  %v1416_v56 = vsel %vm231_vm2, 1.0, %v1799_v29  ;;  %v1417_v16 = vsel %vm232_vm3, 1.0, %v1799_v29 }
  0xb0   :  { %v327_v17 = vadd.f32 %v1416_v56, %v1384_v52  ;;  %vm364_vm4 = vcmp.eq.s32.totalorder %v2377_v8, %v1886_v28  ;;  %vm365_vm5 = vcmp.eq.s32.totalorder %v2380_v9, %v1886_v28  ;;  %v328_v59 = vadd.f32 %v1417_v16, %v1385_v55 }
  0xb1   :  { %v1107_v57 = vadd.f32 %v1590_v51, %v974_v53  ;;  %v1108_v58 = vadd.f32 %v1591_v18, %v975_v54  ;;  %v1448_v60 = vsel %vm364_vm4, 1.0, %v1799_v29  ;;  %v1449_v61 = vsel %vm365_vm5, 1.0, %v1799_v29 }
  0xb2   :  { %v460_v62 = vadd.f32 %v1448_v60, %v327_v17  ;;  %vm497_vm6 = vcmp.eq.s32.totalorder %v2377_v8, %v1890_v32  ;;  %vm498_vm7 = vcmp.eq.s32.totalorder %v2380_v9, %v1890_v32  ;;  %v461_v0 = vadd.f32 %v1449_v61, %v328_v59 }
  0xb3   :  { %v1707_v63 = vpack.c.bf16 %v1108_v58, %v1107_v57  ;;  %v1480_v2 = vsel %vm497_vm6, 1.0, %v1799_v29  ;;  %v1481_v3 = vsel %vm498_vm7, 1.0, %v1799_v29  ;;  %vm630_vm8 = vcmp.eq.s32.totalorder %v2377_v8, %v1892_v33 }
  0xb4   :  { %v593_v4 = vadd.f32 %v1480_v2, %v460_v62  ;;  %vm631_vm9 = vcmp.eq.s32.totalorder %v2380_v9, %v1892_v33  ;;  %vm763_vm10 = vcmp.eq.s32.totalorder %v2377_v8, %v1918_v46  ;;  %v594_v5 = vadd.f32 %v1481_v3, %v461_v0 }
  0xb5   :  { %1708 = vmatpush3.bf16.msra.mxu0 %v1707_v63  ;;  %v1512_v6 = vsel %vm630_vm8, 1.0, %v1799_v29  ;;  %v1513_v7 = vsel %vm631_vm9, 1.0, %v1799_v29  ;;  %vm764_vm11 = vcmp.eq.s32.totalorder %v2380_v9, %v1918_v46  ;;  %1736 = vmatpush3.bf16.msra.mxu1 %v1707_v63  ;;  %v1544_v11 = vsel %vm763_vm10, 1.0, %v1799_v29 }
  0xb6   :  { %v726_v10 = vadd.f32 %v1512_v6, %v593_v4  ;;  %v1545_v13 = vsel %vm764_vm11, 1.0, %v1799_v29  ;;  %vm896_vm12 = vcmp.eq.s32.totalorder %v2377_v8, %v1920_v47  ;;  %v727_v15 = vadd.f32 %v1513_v7, %v594_v5 }
  0xb7   :  { %vm897_vm13 = vcmp.eq.s32.totalorder %v2380_v9, %v1920_v47  ;;  %v1576_v14 = vsel %vm896_vm12, 1.0, %v1799_v29  ;;  %vm1029_vm14 = vcmp.eq.s32.totalorder %v2377_v8, %v1922_v48  ;;  %vm1030_vm15 = vcmp.eq.s32.totalorder %v2380_v9, %v1922_v48 }
  0xb8   :  { %v859_v20 = vadd.f32 %v1544_v11, %v726_v10  ;;  %v1577_v21 = vsel %vm897_vm13, 1.0, %v1799_v29  ;;  %v1608_v23 = vsel %vm1029_vm14, 1.0, %v1799_v29  ;;  %v860_v35 = vadd.f32 %v1545_v13, %v727_v15 }
  0xb9   :  { %v1609_v24 = vsel %vm1030_vm15, 1.0, %v1799_v29  ;;  %v46_v25 = vadd.s32 96, %v1841_v1  ;;  %v47_v26 = vadd.s32 104, %v1841_v1  ;;  %v2465_v31 = vadd.s32 240, %v1841_v1 }
  0xba   :  { %v992_v30 = vadd.f32 %v1576_v14, %v859_v20  ;;  %v2468_v8 = vadd.s32 248, %v1841_v1  ;;  %v2471_v36 = vadd.s32 112, %v1841_v1  ;;  %v993_v9 = vadd.f32 %v1577_v21, %v860_v35 }
  0xbb   :  { %vm82_vm0 = vcmp.eq.s32.totalorder %v46_v25, %v1878_v19  ;;  %vm83_vm1 = vcmp.eq.s32.totalorder %v47_v26, %v1878_v19  ;;  %vm215_vm2 = vcmp.eq.s32.totalorder %v46_v25, %v1884_v27  ;;  %vm216_vm3 = vcmp.eq.s32.totalorder %v47_v26, %v1884_v27 }
  0xbc   :  { %v1125_v37 = vadd.f32 %v1608_v23, %v992_v30  ;;  %v1368_v38 = vsel %vm82_vm0, 1.0, %v1799_v29  ;;  %v1369_v39 = vsel %vm83_vm1, 1.0, %v1799_v29  ;;  %v1126_v40 = vadd.f32 %v1609_v24, %v993_v9 }
  0xbd   :  { %v1400_v41 = vsel %vm215_vm2, 1.0, %v1799_v29  ;;  %v1401_v22 = vsel %vm216_vm3, 1.0, %v1799_v29  ;;  %vm348_vm4 = vcmp.eq.s32.totalorder %v46_v25, %v1886_v28  ;;  %vm349_vm5 = vcmp.eq.s32.totalorder %v47_v26, %v1886_v28 }
  0xbe   :  { %v311_v12 = vadd.f32 %v1400_v41, %v1368_v38  ;;  %v312_v42 = vadd.f32 %v1401_v22, %v1369_v39  ;;  %v1432_v43 = vsel %vm348_vm4, 1.0, %v1799_v29  ;;  %v1709_v44 = vpack.c.bf16 %v1126_v40, %v1125_v37 }
  0xbf   :  { %v1433_v45 = vsel %vm349_vm5, 1.0, %v1799_v29  ;;  %vm481_vm6 = vcmp.eq.s32.totalorder %v46_v25, %v1890_v32  ;;  %vm482_vm7 = vcmp.eq.s32.totalorder %v47_v26, %v1890_v32  ;;  %vm614_vm8 = vcmp.eq.s32.totalorder %v46_v25, %v1892_v33 }
  0xc0   :  { %v444_v49 = vadd.f32 %v1432_v43, %v311_v12  ;;  %v445_v50 = vadd.f32 %v1433_v45, %v312_v42  ;;  %v1464_v34 = vsel %vm481_vm6, 1.0, %v1799_v29  ;;  %v1465_v51 = vsel %vm482_vm7, 1.0, %v1799_v29  ;;  %1710 = vmatprep.subr.bf16.mxu0 %v1709_v44  ;;  %1729 = vmatprep.subr.bf16.mxu1 %v1709_v44 }
  0xc1   :  { %vm615_vm9 = vcmp.eq.s32.totalorder %v47_v26, %v1892_v33  ;;  %vm747_vm10 = vcmp.eq.s32.totalorder %v46_v25, %v1918_v46  ;;  %vm748_vm11 = vcmp.eq.s32.totalorder %v47_v26, %v1918_v46  ;;  %v1496_v53 = vsel %vm614_vm8, 1.0, %v1799_v29 }
  0xc2   :  { %v577_v18 = vadd.f32 %v1464_v34, %v444_v49  ;;  %v578_v52 = vadd.f32 %v1465_v51, %v445_v50  ;;  %v1497_v54 = vsel %vm615_vm9, 1.0, %v1799_v29  ;;  %v1528_v55 = vsel %vm747_vm10, 1.0, %v1799_v29 }
  0xc3   :  { %v1529_v56 = vsel %vm748_vm11, 1.0, %v1799_v29  ;;  %vm880_vm12 = vcmp.eq.s32.totalorder %v46_v25, %v1920_v47  ;;  %vm881_vm13 = vcmp.eq.s32.totalorder %v47_v26, %v1920_v47  ;;  %vm1013_vm14 = vcmp.eq.s32.totalorder %v46_v25, %v1922_v48 }
  0xc4   :  { %v710_v16 = vadd.f32 %v1496_v53, %v577_v18  ;;  %v711_v17 = vadd.f32 %v1497_v54, %v578_v52  ;;  %v1560_v57 = vsel %vm880_vm12, 1.0, %v1799_v29  ;;  %v1561_v58 = vsel %vm881_vm13, 1.0, %v1799_v29 }
  0xc5   :  { %vm1014_vm15 = vcmp.eq.s32.totalorder %v47_v26, %v1922_v48  ;;  %vm100_vm0 = vcmp.eq.s32.totalorder %v2465_v31, %v1878_v19  ;;  %vm101_vm1 = vcmp.eq.s32.totalorder %v2468_v8, %v1878_v19  ;;  %v1592_v61 = vsel %vm1013_vm14, 1.0, %v1799_v29 }
  0xc6   :  { %v843_v59 = vadd.f32 %v1528_v55, %v710_v16  ;;  %v844_v60 = vadd.f32 %v1529_v56, %v711_v17  ;;  %v1593_v62 = vsel %vm1014_vm15, 1.0, %v1799_v29  ;;  %v1386_v63 = vsel %vm100_vm0, 1.0, %v1799_v29 }
  0xc7   :  { %v1387_v0 = vsel %vm101_vm1, 1.0, %v1799_v29  ;;  %vm233_vm2 = vcmp.eq.s32.totalorder %v2465_v31, %v1884_v27  ;;  %vm234_vm3 = vcmp.eq.s32.totalorder %v2468_v8, %v1884_v27  ;;  %vm366_vm4 = vcmp.eq.s32.totalorder %v2465_v31, %v1886_v28 }
  0xc8   :  { %v976_v2 = vadd.f32 %v1560_v57, %v843_v59  ;;  %v977_v3 = vadd.f32 %v1561_v58, %v844_v60  ;;  %v1418_v4 = vsel %vm233_vm2, 1.0, %v1799_v29  ;;  %v1419_v5 = vsel %vm234_vm3, 1.0, %v1799_v29 }
  0xc9   :  { %v329_v6 = vadd.f32 %v1418_v4, %v1386_v63  ;;  %v330_v7 = vadd.f32 %v1419_v5, %v1387_v0  ;;  %vm367_vm5 = vcmp.eq.s32.totalorder %v2468_v8, %v1886_v28  ;;  %v1450_v13 = vsel %vm366_vm4, 1.0, %v1799_v29 }
  0xca   :  { %v1109_v10 = vadd.f32 %v1592_v61, %v976_v2  ;;  %v1110_v11 = vadd.f32 %v1593_v62, %v977_v3  ;;  %v1451_v15 = vsel %vm367_vm5, 1.0, %v1799_v29  ;;  %vm499_vm6 = vcmp.eq.s32.totalorder %v2465_v31, %v1890_v32 }
  0xcb   :  { %v462_v14 = vadd.f32 %v1450_v13, %v329_v6  ;;  %v463_v20 = vadd.f32 %v1451_v15, %v330_v7  ;;  %vm500_vm7 = vcmp.eq.s32.totalorder %v2468_v8, %v1890_v32  ;;  %v1482_v23 = vsel %vm499_vm6, 1.0, %v1799_v29  ;;  %v1129_v7 = vld [vmem:[#allocation2] sm:$0xff]  ;;  %v1134_v15 = vld [vmem:[#allocation2 + $0x28] sm:$0xff] }
  0xcc   :  { %v1711_v21 = vpack.c.bf16 %v1110_v11, %v1109_v10  ;;  %v1483_v35 = vsel %vm500_vm7, 1.0, %v1799_v29  ;;  %vm632_vm8 = vcmp.eq.s32.totalorder %v2465_v31, %v1892_v33  ;;  %vm633_vm9 = vcmp.eq.s32.totalorder %v2468_v8, %v1892_v33  ;;  %v1139_v10 = vld [vmem:[#allocation2 + $0x50] sm:$0xff]  ;;  %v1142_v11 = vld [vmem:[#allocation2 + $0x68] sm:$0xff]  ;;  %v1141_v13 = vld [vmem:[#allocation2 + $0x60] sm:$0xff] }
  0xcd   :  { %v595_v24 = vadd.f32 %v1482_v23, %v462_v14  ;;  %v596_v25 = vadd.f32 %v1483_v35, %v463_v20  ;;  %v1514_v26 = vsel %vm632_vm8, 1.0, %v1799_v29  ;;  %v1515_v30 = vsel %vm633_vm9, 1.0, %v1799_v29  ;;  %v1144_v14 = vld [vmem:[#allocation2 + $0x78] sm:$0xff]  ;;  %v1133_v20 = vld [vmem:[#allocation2 + $0x20] sm:$0xff]  ;;  %v1135_v35 = vld [vmem:[#allocation2 + $0x30] sm:$0xff] }
  0xce   :  { %1712 = vmatpush3.bf16.msra.mxu0 %v1711_v21  ;;  %vm765_vm10 = vcmp.eq.s32.totalorder %v2465_v31, %v1918_v46  ;;  %vm766_vm11 = vcmp.eq.s32.totalorder %v2468_v8, %v1918_v46  ;;  %vm898_vm12 = vcmp.eq.s32.totalorder %v2465_v31, %v1920_v47  ;;  %1737 = vmatpush3.bf16.msra.mxu1 %v1711_v21  ;;  %v49_v44 = vadd.s32 120, %v1841_v1  ;;  %v1143_v21 = vld [vmem:[#allocation2 + $0x70] sm:$0xff]  ;;  %v1136_v23 = vld [vmem:[#allocation2 + $0x38] sm:$0xff] }
  0xcf   :  { %v728_v9 = vadd.f32 %v1514_v26, %v595_v24  ;;  %v729_v37 = vadd.f32 %v1515_v30, %v596_v25  ;;  %v1546_v38 = vsel %vm765_vm10, 1.0, %v1799_v29  ;;  %v1547_v39 = vsel %vm766_vm11, 1.0, %v1799_v29  ;;  %v1138_v24 = vld [vmem:[#allocation2 + $0x48] sm:$0xff]  ;;  %v1137_v25 = vld [vmem:[#allocation2 + $0x40] sm:$0xff] }
  0xd0   :  { %vm899_vm13 = vcmp.eq.s32.totalorder %v2468_v8, %v1920_v47  ;;  %v1578_v40 = vsel %vm898_vm12, 1.0, %v1799_v29  ;;  %vm1031_vm14 = vcmp.eq.s32.totalorder %v2465_v31, %v1922_v48  ;;  %vm1032_vm15 = vcmp.eq.s32.totalorder %v2468_v8, %v1922_v48  ;;  %v1259_v30 = vld [vmem:[%s2616_s3] sm:$0x3] }
  0xd1   :  { %v861_v41 = vadd.f32 %v1546_v38, %v728_v9  ;;  %v862_v22 = vadd.f32 %v1547_v39, %v729_v37  ;;  %v1579_v12 = vsel %vm899_vm13, 1.0, %v1799_v29  ;;  %v1610_v42 = vsel %vm1031_vm14, 1.0, %v1799_v29 }
  0xd2   :  { %v1611_v43 = vsel %vm1032_vm15, 1.0, %v1799_v29  ;;  %vm84_vm0 = vcmp.eq.s32.totalorder %v2471_v36, %v1878_v19  ;;  %vm217_vm1 = vcmp.eq.s32.totalorder %v2471_v36, %v1884_v27  ;;  %vm85_vm2 = vcmp.eq.s32.totalorder %v49_v44, %v1878_v19 }
  0xd3   :  { %v994_v31 = vadd.f32 %v1578_v40, %v861_v41  ;;  %v995_v45 = vadd.f32 %v1579_v12, %v862_v22  ;;  %v1370_v8 = vsel %vm84_vm0, 1.0, %v1799_v29  ;;  %v1402_v49 = vsel %vm217_vm1, 1.0, %v1799_v29 }
  0xd4   :  { %vm218_vm3 = vcmp.eq.s32.totalorder %v49_v44, %v1884_v27  ;;  %v313_v50 = vadd.f32 %v1402_v49, %v1370_v8  ;;  %vm350_vm4 = vcmp.eq.s32.totalorder %v2471_v36, %v1886_v28  ;;  %v1371_v51 = vsel %vm85_vm2, 1.0, %v1799_v29 }
  0xd5   :  { %v1127_v1 = vadd.f32 %v1610_v42, %v994_v31  ;;  %v1128_v34 = vadd.f32 %v1611_v43, %v995_v45  ;;  %v1403_v18 = vsel %vm218_vm3, 1.0, %v1799_v29  ;;  %vm351_vm5 = vcmp.eq.s32.totalorder %v49_v44, %v1886_v28 }
  0xd6   :  { %v314_v52 = vadd.f32 %v1403_v18, %v1371_v51  ;;  %v1434_v53 = vsel %vm350_vm4, 1.0, %v1799_v29  ;;  %vm483_vm6 = vcmp.eq.s32.totalorder %v2471_v36, %v1890_v32  ;;  %v1435_v27 = vsel %vm351_vm5, 1.0, %v1799_v29 }
  0xd7   :  { %v1713_v19 = vpack.c.bf16 %v1128_v34, %v1127_v1  ;;  %v446_v54 = vadd.f32 %v1434_v53, %v313_v50  ;;  %vm484_vm7 = vcmp.eq.s32.totalorder %v49_v44, %v1890_v32  ;;  %v1466_v56 = vsel %vm483_vm6, 1.0, %v1799_v29 }
  0xd8   :  { %v447_v55 = vadd.f32 %v1435_v27, %v314_v52  ;;  %v1467_v16 = vsel %vm484_vm7, 1.0, %v1799_v29  ;;  %vm616_vm8 = vcmp.eq.s32.totalorder %v2471_v36, %v1892_v33  ;;  %vm617_vm9 = vcmp.eq.s32.totalorder %v49_v44, %v1892_v33 }
  0xd9   :  { %1714 = vmatprep.subr.bf16.mxu0 %v1713_v19  ;;  %v579_v28 = vadd.f32 %v1466_v56, %v446_v54  ;;  %v1498_v17 = vsel %vm616_vm8, 1.0, %v1799_v29  ;;  %vm749_vm10 = vcmp.eq.s32.totalorder %v2471_v36, %v1918_v46  ;;  %1730 = vmatprep.subr.bf16.mxu1 %v1713_v19  ;;  %v1499_v32 = vsel %vm617_vm9, 1.0, %v1799_v29 }
  0xda   :  { %v580_v57 = vadd.f32 %v1467_v16, %v447_v55  ;;  %vm750_vm11 = vcmp.eq.s32.totalorder %v49_v44, %v1918_v46  ;;  %v1530_v58 = vsel %vm749_vm10, 1.0, %v1799_v29  ;;  %vm882_vm12 = vcmp.eq.s32.totalorder %v2471_v36, %v1920_v47 }
  0xdb   :  { %v712_v59 = vadd.f32 %v1498_v17, %v579_v28  ;;  %v1531_v60 = vsel %vm750_vm11, 1.0, %v1799_v29  ;;  %vm883_vm13 = vcmp.eq.s32.totalorder %v49_v44, %v1920_v47  ;;  %v1562_v61 = vsel %vm882_vm12, 1.0, %v1799_v29 }
  0xdc   :  { %v713_v33 = vadd.f32 %v1499_v32, %v580_v57  ;;  %vm1015_vm14 = vcmp.eq.s32.totalorder %v2471_v36, %v1922_v48  ;;  %v1563_v63 = vsel %vm883_vm13, 1.0, %v1799_v29  ;;  %vm1016_vm15 = vcmp.eq.s32.totalorder %v49_v44, %v1922_v48  ;;  %v1132_v36 = vld [vmem:[#allocation2 + $0x18] sm:$0xff]  ;;  %v1131_v48 = vld [vmem:[#allocation2 + $0x10] sm:$0xff] }
  0xdd   :  { %v845_v62 = vadd.f32 %v1530_v58, %v712_v59  ;;  %v1594_v0 = vsel %vm1015_vm14, 1.0, %v1799_v29  ;;  %v1595_v3 = vsel %vm1016_vm15, 1.0, %v1799_v29  ;;  %v1800_v26 = vmov 0.0|0.0  }
  0xde   :  { %v846_v46 = vadd.f32 %v1531_v60, %v713_v33  ;;  %vm1801_vm0 = vmmov 0   ;;  %v1802_v9 = vmov 0   ;;  %v1258_v60 = vld [vmem:[%s2615_s2] sm:$0x3]  ;;  %vm1265_vm1 = vcmask 261120  }
  0xdf   :  { %v978_v2 = vadd.f32 %v1562_v61, %v845_v62  ;;  %1747 = vset.pattern.permute.xlu0 %v1802_v9  ;;  %vm1339_vm2 = vcmask 9216  }
  0xe0   :  { %v979_v4 = vadd.f32 %v1563_v63, %v846_v46  ;;  %1262 = vperm.xlu0 %1747, %v1259_v30  }
  0xe1   :  { %v1111_v5 = vadd.f32 %v1594_v0, %v978_v2 }
  0xe2   :  { %v1112_v47 = vadd.f32 %v1595_v3, %v979_v4 }
  0xe4   :  { %v1715_v6 = vpack.c.bf16 %v1112_v47, %v1111_v5 }
  0xe6   :  { %1716 = vmatpush3.bf16.msra.mxu0 %v1715_v6  ;;  %1738 = vmatpush3.bf16.msra.mxu1 %v1715_v6 }
  0xe7   :  { %1717 = vmatprep.subr.bf16.mxu1 %v1800_v26 }
  0xe9   :  { %1210 = vmatmul.mubr.f32.vlgmr.msra.gmra.mrb[0].mxu0 %v1129_v7  ;;  %1235 = vmatmul.mubr.f32.vlgmr.msra.gmra.mrb[0].mxu1 %v1139_v10 }
  0xea   :  { %1214 = vmatprep.mubr.f32.mxu0 %v1132_v36  ;;  %1239 = vmatprep.mubr.f32.mxu1 %v1142_v11 }
  0xed   :  { %1215 = vmatmul.mubr.f32.gmra.mrb[2].mxu0 %v1131_v48  ;;  %1240 = vmatmul.mubr.f32.gmra.mrb[2].mxu1 %v1141_v13 }
  0xee   :  { %1219 = vmatprep.mubr.f32.mxu0 %v1134_v15  ;;  %1244 = vmatprep.mubr.f32.mxu1 %v1144_v14 }
  0xf1   :  { %1220 = vmatmul.mubr.f32.gmra.mrb[4].mxu0 %v1133_v20  ;;  %1245 = vmatmul.mubr.f32.gmra.mrb[4].mxu1 %v1143_v21 }
  0xf2   :  { %1224 = vmatprep.mubr.f32.mxu0 %v1136_v23  ;;  %1682 = vmatprep.mubr.msk.f32.mxu1 %vm1801_vm0, %v1799_v29 }
  0xf5   :  { %1225 = vmatmul.mubr.f32.gmra.mrb[6].mxu0 %v1135_v35 }
  0xf6   :  { %1229 = vmatprep.mubr.f32.mxu0 %v1138_v24 }
  0xf9   :  { %1230 = vmatmul.mubr.f32.gmra.mrb[8].mxu0 %v1137_v25 }
 0x15f   :  { %v1263_v33 = vpop.permute.xlu0 %1262 }
 0x1bc   :  { %v1645_v37 = vpop.f32.mrb[0].mxu0  ;;  %v1660_v38 = vpop.f32.mrb[0].mxu1 }
 0x1bd   :  { %v1646_v39 = vpop.f32.mrb[1].mxu0  ;;  %v1661_v40 = vpop.f32.mrb[1].mxu1 }
 0x1be   :  { %v1647_v41 = vadd.f32 %v1646_v39, %v1645_v37  ;;  %v1662_v22 = vadd.f32 %v1661_v40, %v1660_v38 }
 0x1c0   :  { %v1648_v12 = vpop.f32.mrb[2].mxu0  ;;  %v1663_v42 = vpop.f32.mrb[2].mxu1 }
 0x1c1   :  { %v1649_v43 = vpop.f32.mrb[3].mxu0  ;;  %v1664_v44 = vpop.f32.mrb[3].mxu1 }
 0x1c2   :  { %v1650_v31 = vadd.f32 %v1649_v43, %v1648_v12  ;;  %v1665_v45 = vadd.f32 %v1664_v44, %v1663_v42 }
 0x1c4   :  { %v1251_v29 = vmax.f32 %v1650_v31, %v1662_v22  ;;  %v1651_v8 = vpop.f32.mrb[4].mxu0  ;;  %v1666_v49 = vpop.f32.mrb[4].mxu1 }
 0x1c5   :  { %v1652_v50 = vpop.f32.mrb[5].mxu0  ;;  %v1667_v1 = vpop.f32.mrb[5].mxu1 }
 0x1c6   :  { %v1653_v34 = vadd.f32 %v1652_v50, %v1651_v8  ;;  %v1668_v51 = vadd.f32 %v1667_v1, %v1666_v49  ;;  %v1255_v32 = vmax.f32 %v1251_v29, 0.0 }
 0x1c8   :  { %v1252_v18 = vmax.f32 %v1653_v34, %v1665_v45  ;;  %v1654_v52 = vpop.f32.mrb[6].mxu0 }
 0x1c9   :  { %v1655_v53 = vpop.f32.mrb[7].mxu0 }
 0x1ca   :  { %v1656_v19 = vadd.f32 %v1655_v53, %v1654_v52  ;;  %v1256_v56 = vmax.f32 %v1252_v18, 0.0 }
 0x1cc   :  { %v1253_v27 = vmax.f32 %v1656_v19, %v1668_v51  ;;  %v1657_v54 = vpop.f32.mrb[8].mxu0 }
 0x1cd   :  { %v1658_v55 = vpop.f32.mrb[9].mxu0 }
 0x1ce   :  { %v1257_v16 = vmax.f32 %v1253_v27, 0.0  ;;  %v1659_v28 = vadd.f32 %v1658_v55, %v1657_v54 }
 0x1d0   :  { %v1721_v17 = vpack.c.bf16 %v1257_v16, %v1256_v56  ;;  %v1250_v57 = vmax.f32 %v1647_v41, %v1659_v28 }
 0x1d2   :  { %v1254_v58 = vmax.f32 %v1250_v57, 0.0 }
 0x1d4   :  { %v1718_v59 = vpack.c.bf16 %v1255_v32, %v1254_v58 }
 0x1d6   :  { %1719 = vmatpush3.bf16.msra.mxu1 %v1718_v59 }
 0x1d7   :  { %1720 = vmatprep.subr.bf16.mxu1 %v1800_v26 }
 0x1da   :  { %1722 = vmatpush3.bf16.msra.mxu1 %v1721_v17 }
 0x1dd   :  { %1683 = vmatmul.mubr.msk.f32.vlgmr.msra.gmra.mrb[6].mxu1 %vm1265_vm1, %v1258_v60 }
 0x2b0   :  { %v1335_v61 = vpop.f32.mrb[6].mxu1 }
 0x2b1   :  { %v1336_v62 = vadd.f32 %v1335_v61, %v1263_v33  ;;  %v1684_v63 = vpop.f32.mrb[7].mxu1 }
 0x2b3   :  { %1340 = vst.msk [vmem:[#allocation5] sm:$0x3] %vm1339_vm2, %v1336_v62 }
 0x2b4   :  { %1781 = shalt.err (!%p1778_p12)
}
 0x2b5   :  { %s1782_s10 = scalar_lea.hbm %s2617_s4, 32 }
 0x2b6   :  { %p1783_p13 = scmp.ne.s32.totalorder %s2617_s4, %s1782_s10  ;;  %p1786_p0 = scmp.lt.u32.totalorder %s1782_s10, %s2617_s4 }
 0x2b8   :  { %p1788_p1 = pnand %p1786_p0, %p1783_p13 }
 0x2ba   :  { %1791 = shalt.err (!%p1788_p1)
}
 0x2bb   :  { %1350 = dma.vmem_to_hbm [thread:$0]  %s1348_s7, 32, %s2617_s4, [#allocation4]  }
 0x2bc   :  { %1794 = dma.done.wait [#allocation4], 32  }
 0x2bd   :  { %1795 = vsyncadd [#allocation4], 4294967264 }
 0x2be   :  { %1354 = vsyncpa [#allocation3], 1 }
 0x2bf   :  { %1355 = vsyncpa [#allocation4], 1 }

</bundles_post_ra>
